<compile_context>
chip_gen: v5e
topology: v5e:2x2
jax: 0.10.0
libtpu: 0.0.40
codegen_flags: <defaults>
</compile_context>

<pallas_src>
import jax
import jax.numpy as jnp
from jax import lax
from jax.experimental import pallas as pl
from jax.experimental.pallas import tpu as pltpu


def _make_upsample_kernel(channel, th, w):
    two_w = 2 * w

    def kernel(x_ref, wp_ref, bp_ref, o_ref):
        # x_ref : (Cin, TH, W)        input rows, W on lanes
        # wp_ref: (Cout, Cin)         1x1-conv weight, rows permuted to (j, i, c)
        # bp_ref: (Cout, 1)           bias, same permutation
        # o_ref : (channel, TH, 4W)   fused pixel-shuffled output rows
        wp = wp_ref[...]
        bp = bp_ref[...]
        # Constant 0/1 spread matrices: E[w, 2w] = 1, O[w, 2w+1] = 1.
        row = lax.broadcasted_iota(jnp.int32, (w, two_w), 0)
        col = lax.broadcasted_iota(jnp.int32, (w, two_w), 1)
        e_mat = (col == 2 * row).astype(jnp.float32)
        o_mat = (col == 2 * row + 1).astype(jnp.float32)
        for t in range(th):  # static (unrolled) loop over image rows in the block
            xt = x_ref[:, t, :]                                       # (Cin, W)
            y = jnp.dot(wp, xt, preferred_element_type=jnp.float32) + bp  # (Cout, W)
            # rows [0:2c] are the j=0 conv outputs, rows [2c:4c] the j=1 outputs,
            # both ordered (i, c).  Interleave along lanes via the MXU.
            z = (jnp.dot(y[: 2 * channel], e_mat, preferred_element_type=jnp.float32)
                 + jnp.dot(y[2 * channel:], o_mat, preferred_element_type=jnp.float32))
            # z: (2*channel, 2W), rows ordered (i, c), lane index 2w+j.
            o_ref[:, t, 0:two_w] = z[:channel].astype(o_ref.dtype)    # i = 0 half-row
            o_ref[:, t, two_w:] = z[channel:].astype(o_ref.dtype)     # i = 1 half-row

    return kernel


def _vmem_capacity_bytes():
    try:
        return int(pltpu.get_tpu_info().vmem_capacity_bytes)
    except Exception:
        return 64 * 1024 * 1024  # conservative (v7x per-TensorCore VMEM)


def _pick_row_tile(n, h, per_row_bytes, budget_bytes, max_rows=64):
    """Largest legal row-tile (divides H, mult-of-8 or ==H) fitting the budget."""
    legal = [t for t in range(1, h + 1) if h % t == 0 and (t % 8 == 0 or t == h)]
    capped = [t for t in legal if t <= max_rows] or [min(legal)]
    fitting = [t for t in capped if t * per_row_bytes <= budget_bytes]
    th = max(fitting) if fitting else min(capped)
    # keep at least 2 grid steps so both v7x TensorCores get work
    if n * (h // th) < 2:
        smaller = [t for t in capped if t < th]
        if smaller:
            th = max(smaller)
    return th


def upsample_forward(x_nchw, w, b, channel):
    """UpSample forward: 1x1 Conv2d(2c -> 4c, bias) + PixelShuffle(2), fused.

    x_nchw : (N, 2*channel, H, W)
    w      : (4*channel, 2*channel)   conv weight (Cout, Cin)
    b      : (4*channel,)             conv bias
    returns: (N, channel, 2*H, 2*W)
    """
    N, Cin, H, W = x_nchw.shape
    Cout = 4 * channel
    assert Cin == 2 * channel and w.shape == (Cout, Cin)
    itemsize = x_nchw.dtype.itemsize

    # Permute conv-output channels to (j, i, c) order so the PixelShuffle groups
    # become contiguous row slices of the in-kernel matmul result.
    perm = (4 * jnp.arange(channel)[None, None, :]
            + 2 * jnp.arange(2)[None, :, None]
            + jnp.arange(2)[:, None, None]).reshape(-1)     # order (j, i, c)
    w_p = w[perm]                        # (Cout, Cin)
    b_p = b[perm].reshape(Cout, 1)

    vmem_cap = _vmem_capacity_bytes()
    budget = min(vmem_cap // 4, 24 * 1024 * 1024)
    per_row = 2 * (Cin + Cout) * W * itemsize          # double-buffered in + out per row
    TH = _pick_row_tile(N, H, per_row, budget)

    footprint = (per_row * TH                          # pipelined x / out blocks
                 + 2 * W * (2 * W) * 4                 # in-kernel spread matrices
                 + 2 * (Cout * Cin + Cout) * itemsize)  # weights + bias (double-buffered)
    vmem_limit = int(min(max(2 * footprint + (4 << 20), 16 << 20), 48 << 20))

    kernel = _make_upsample_kernel(channel, TH, W)
    out = pl.pallas_call(
        kernel,
        out_shape=jax.ShapeDtypeStruct((N, channel, H, 4 * W), x_nchw.dtype),
        grid_spec=pltpu.PrefetchScalarGridSpec(
            num_scalar_prefetch=0,
            grid=(N, H // TH),
            in_specs=[
                pl.BlockSpec((pl.Squeezed(), Cin, TH, W), lambda n, t: (n, 0, t, 0)),
                pl.BlockSpec((Cout, Cin), lambda n, t: (0, 0)),
                pl.BlockSpec((Cout, 1), lambda n, t: (0, 0)),
            ],
            out_specs=pl.BlockSpec((pl.Squeezed(), channel, TH, 4 * W),
                                   lambda n, t: (n, 0, t, 0)),
        ),
        compiler_params=pltpu.CompilerParams(
            dimension_semantics=("parallel", "parallel"),
            vmem_limit_bytes=vmem_limit,
        ),
    )(x_nchw, w_p, b_p)

    # (N, C, H, 4W) and (N, C, 2H, 2W) share the same row-major linearisation
    # (lane = i*2W + 2w + j)  ->  this reshape is free (no transpose, no copy).
    return out.reshape(N, channel, 2 * H, 2 * W)


if __name__ == "__main__":
    channel = 4
    N, H, W = 2, 16, 16
    Cin, Cout = 2 * channel, 4 * channel  # 8, 16

    key = jax.random.PRNGKey(0)
    kx, kw, kb = jax.random.split(key, 3)
    x = jax.random.normal(kx, (N, Cin, H, W), dtype=jnp.float32)
    # Deterministic "kaiming-ish" init for the 1x1 conv weight/bias.
    w = jax.random.normal(kw, (Cout, Cin), dtype=jnp.float32) * (1.0 / jnp.sqrt(Cin))
    b = jax.random.normal(kb, (Cout,), dtype=jnp.float32) * 0.01

    out = upsample_forward(x, w, b, channel)
    out = jax.block_until_ready(out)
    assert out.shape == (N, channel, 2 * H, 2 * W), out.shape

    # Pure-JAX reference (1x1 conv + pixel shuffle).
    ref_conv = jnp.einsum("nchw,oc->nohw", x, w) + b[None, :, None, None]
    ref = ref_conv.reshape(N, channel, 2, 2, H, W)
    ref = jnp.transpose(ref, (0, 1, 4, 2, 5, 3)).reshape(N, channel, 2 * H, 2 * W)
    assert jnp.allclose(out, ref, atol=1e-5, rtol=1e-5)

    print("KERNEL_OK")
</pallas_src>

<mosaic_0001>
module attributes {stable_mosaic.version = 11 : i64} {
  func.func @kernel(%arg0: i32, %arg1: i32, %arg2: memref<1x8x16x16xf32, #tpu.memory_space<vmem>>, %arg3: memref<16x8xf32, #tpu.memory_space<vmem>>, %arg4: memref<16x1xf32, #tpu.memory_space<vmem>>, %arg5: memref<1x4x16x64xf32, #tpu.memory_space<vmem>>) attributes {dimension_semantics = [#tpu.dimension_semantics<parallel>, #tpu.dimension_semantics<parallel>], iteration_bounds = array<i64: 2, 1>, scalar_prefetch = 0 : i64, scratch_operands = 0 : i64, tpu.core_type = #tpu.core_type<tc>, window_params = [{transform_indices = @transform_0, window_bounds = array<i64: 1, 8, 16, 16>}, {pipeline_mode = #tpu.pipeline_mode<synchronous>, transform_indices = @transform_1, window_bounds = array<i64: 16, 8>}, {pipeline_mode = #tpu.pipeline_mode<synchronous>, transform_indices = @transform_2, window_bounds = array<i64: 16, 1>}, {transform_indices = @transform_3, window_bounds = array<i64: 1, 4, 16, 64>}]} {
    %c0 = arith.constant 0 : index
    %c0_0 = arith.constant 0 : index
    %0 = vector.load %arg3[%c0, %c0_0] : memref<16x8xf32, #tpu.memory_space<vmem>>, vector<16x8xf32>
    %c0_1 = arith.constant 0 : index
    %c0_2 = arith.constant 0 : index
    %1 = vector.load %arg4[%c0_1, %c0_2] : memref<16x1xf32, #tpu.memory_space<vmem>>, vector<16x1xf32>
    %2 = tpu.iota {dimensions = array<i32: 0>} : vector<16x32xi32>
    %3 = tpu.iota {dimensions = array<i32: 1>} : vector<16x32xi32>
    %c2_i32 = arith.constant 2 : i32
    %4 = vector.broadcast %c2_i32 : i32 to vector<16x32xi32>
    %5 = arith.muli %4, %2 : vector<16x32xi32>
    %6 = arith.cmpi eq, %3, %5 : vector<16x32xi32>
    %7 = arith.extui %6 : vector<16x32xi1> to vector<16x32xi32>
    %8 = arith.sitofp %7 : vector<16x32xi32> to vector<16x32xf32>
    %c2_i32_3 = arith.constant 2 : i32
    %9 = vector.broadcast %c2_i32_3 : i32 to vector<16x32xi32>
    %10 = arith.muli %9, %2 : vector<16x32xi32>
    %c1_i32 = arith.constant 1 : i32
    %11 = vector.broadcast %c1_i32 : i32 to vector<16x32xi32>
    %12 = arith.addi %10, %11 : vector<16x32xi32>
    %13 = arith.cmpi eq, %3, %12 : vector<16x32xi32>
    %14 = arith.extui %13 : vector<16x32xi1> to vector<16x32xi32>
    %15 = arith.sitofp %14 : vector<16x32xi32> to vector<16x32xf32>
    %c0_4 = arith.constant 0 : index
    %c0_5 = arith.constant 0 : index
    %c0_6 = arith.constant 0 : index
    %c0_7 = arith.constant 0 : index
    %16 = vector.load %arg2[%c0_4, %c0_5, %c0_6, %c0_7] : memref<1x8x16x16xf32, #tpu.memory_space<vmem>>, vector<1x8x1x16xf32>
    %17 = vector.shape_cast %16 : vector<1x8x1x16xf32> to vector<8x16xf32>
    %cst = arith.constant dense<0.000000e+00> : vector<16x16xf32>
    %18 = tpu.matmul %0, %17, %cst {dimension_numbers = #tpu.dot_dimension_numbers<[1], [0], [0], [1], [0, 0, 1, 1], [], []>} : vector<16x8xf32>, vector<8x16xf32>, vector<16x16xf32> -> vector<16x16xf32>
    %19 = vector.broadcast %1 : vector<16x1xf32> to vector<16x16xf32>
    %20 = arith.addf %18, %19 : vector<16x16xf32>
    %21 = vector.extract_strided_slice %20 {offsets = [0, 0], sizes = [8, 16], strides = [1, 1]} : vector<16x16xf32> to vector<8x16xf32>
    %cst_8 = arith.constant dense<0.000000e+00> : vector<8x32xf32>
    %22 = tpu.matmul %21, %8, %cst_8 {dimension_numbers = #tpu.dot_dimension_numbers<[1], [0], [0], [1], [0, 0, 1, 1], [], []>} : vector<8x16xf32>, vector<16x32xf32>, vector<8x32xf32> -> vector<8x32xf32>
    %23 = vector.extract_strided_slice %20 {offsets = [8, 0], sizes = [8, 16], strides = [1, 1]} : vector<16x16xf32> to vector<8x16xf32>
    %cst_9 = arith.constant dense<0.000000e+00> : vector<8x32xf32>
    %24 = tpu.matmul %23, %15, %cst_9 {dimension_numbers = #tpu.dot_dimension_numbers<[1], [0], [0], [1], [0, 0, 1, 1], [], []>} : vector<8x16xf32>, vector<16x32xf32>, vector<8x32xf32> -> vector<8x32xf32>
    %25 = arith.addf %22, %24 : vector<8x32xf32>
    %26 = vector.extract_strided_slice %25 {offsets = [0, 0], sizes = [4, 32], strides = [1, 1]} : vector<8x32xf32> to vector<4x32xf32>
    %c0_10 = arith.constant 0 : index
    %c0_11 = arith.constant 0 : index
    %c0_12 = arith.constant 0 : index
    %c0_13 = arith.constant 0 : index
    %27 = vector.load %arg5[%c0_10, %c0_11, %c0_12, %c0_13] : memref<1x4x16x64xf32, #tpu.memory_space<vmem>>, vector<1x4x1x32xf32>
    %28 = vector.shape_cast %27 : vector<1x4x1x32xf32> to vector<4x32xf32>
    %29 = vector.shape_cast %26 : vector<4x32xf32> to vector<1x4x1x32xf32>
    tpu.vector_store %arg5[%c0_10, %c0_11, %c0_12, %c0_13], %29 {strides = array<i32>} : memref<1x4x16x64xf32, #tpu.memory_space<vmem>>, vector<1x4x1x32xf32>,
    %30 = vector.extract_strided_slice %25 {offsets = [4, 0], sizes = [4, 32], strides = [1, 1]} : vector<8x32xf32> to vector<4x32xf32>
    %c0_14 = arith.constant 0 : index
    %c0_15 = arith.constant 0 : index
    %c0_16 = arith.constant 0 : index
    %c32 = arith.constant 32 : index
    %31 = vector.load %arg5[%c0_14, %c0_15, %c0_16, %c32] : memref<1x4x16x64xf32, #tpu.memory_space<vmem>>, vector<1x4x1x32xf32>
    %32 = vector.shape_cast %31 : vector<1x4x1x32xf32> to vector<4x32xf32>
    %33 = vector.shape_cast %30 : vector<4x32xf32> to vector<1x4x1x32xf32>
    tpu.vector_store %arg5[%c0_14, %c0_15, %c0_16, %c32], %33 {strides = array<i32>} : memref<1x4x16x64xf32, #tpu.memory_space<vmem>>, vector<1x4x1x32xf32>,
    %c0_17 = arith.constant 0 : index
    %c0_18 = arith.constant 0 : index
    %c1 = arith.constant 1 : index
    %c0_19 = arith.constant 0 : index
    %34 = vector.load %arg2[%c0_17, %c0_18, %c1, %c0_19] : memref<1x8x16x16xf32, #tpu.memory_space<vmem>>, vector<1x8x1x16xf32>
    %35 = vector.shape_cast %34 : vector<1x8x1x16xf32> to vector<8x16xf32>
    %cst_20 = arith.constant dense<0.000000e+00> : vector<16x16xf32>
    %36 = tpu.matmul %0, %35, %cst_20 {dimension_numbers = #tpu.dot_dimension_numbers<[1], [0], [0], [1], [0, 0, 1, 1], [], []>} : vector<16x8xf32>, vector<8x16xf32>, vector<16x16xf32> -> vector<16x16xf32>
    %37 = vector.broadcast %1 : vector<16x1xf32> to vector<16x16xf32>
    %38 = arith.addf %36, %37 : vector<16x16xf32>
    %39 = vector.extract_strided_slice %38 {offsets = [0, 0], sizes = [8, 16], strides = [1, 1]} : vector<16x16xf32> to vector<8x16xf32>
    %cst_21 = arith.constant dense<0.000000e+00> : vector<8x32xf32>
    %40 = tpu.matmul %39, %8, %cst_21 {dimension_numbers = #tpu.dot_dimension_numbers<[1], [0], [0], [1], [0, 0, 1, 1], [], []>} : vector<8x16xf32>, vector<16x32xf32>, vector<8x32xf32> -> vector<8x32xf32>
    %41 = vector.extract_strided_slice %38 {offsets = [8, 0], sizes = [8, 16], strides = [1, 1]} : vector<16x16xf32> to vector<8x16xf32>
    %cst_22 = arith.constant dense<0.000000e+00> : vector<8x32xf32>
    %42 = tpu.matmul %41, %15, %cst_22 {dimension_numbers = #tpu.dot_dimension_numbers<[1], [0], [0], [1], [0, 0, 1, 1], [], []>} : vector<8x16xf32>, vector<16x32xf32>, vector<8x32xf32> -> vector<8x32xf32>
    %43 = arith.addf %40, %42 : vector<8x32xf32>
    %44 = vector.extract_strided_slice %43 {offsets = [0, 0], sizes = [4, 32], strides = [1, 1]} : vector<8x32xf32> to vector<4x32xf32>
    %c0_23 = arith.constant 0 : index
    %c0_24 = arith.constant 0 : index
    %c1_25 = arith.constant 1 : index
    %c0_26 = arith.constant 0 : index
    %45 = vector.load %arg5[%c0_23, %c0_24, %c1_25, %c0_26] : memref<1x4x16x64xf32, #tpu.memory_space<vmem>>, vector<1x4x1x32xf32>
    %46 = vector.shape_cast %45 : vector<1x4x1x32xf32> to vector<4x32xf32>
    %47 = vector.shape_cast %44 : vector<4x32xf32> to vector<1x4x1x32xf32>
    tpu.vector_store %arg5[%c0_23, %c0_24, %c1_25, %c0_26], %47 {strides = array<i32>} : memref<1x4x16x64xf32, #tpu.memory_space<vmem>>, vector<1x4x1x32xf32>,
    %48 = vector.extract_strided_slice %43 {offsets = [4, 0], sizes = [4, 32], strides = [1, 1]} : vector<8x32xf32> to vector<4x32xf32>
    %c0_27 = arith.constant 0 : index
    %c0_28 = arith.constant 0 : index
    %c1_29 = arith.constant 1 : index
    %c32_30 = arith.constant 32 : index
    %49 = vector.load %arg5[%c0_27, %c0_28, %c1_29, %c32_30] : memref<1x4x16x64xf32, #tpu.memory_space<vmem>>, vector<1x4x1x32xf32>
    %50 = vector.shape_cast %49 : vector<1x4x1x32xf32> to vector<4x32xf32>
    %51 = vector.shape_cast %48 : vector<4x32xf32> to vector<1x4x1x32xf32>
    tpu.vector_store %arg5[%c0_27, %c0_28, %c1_29, %c32_30], %51 {strides = array<i32>} : memref<1x4x16x64xf32, #tpu.memory_space<vmem>>, vector<1x4x1x32xf32>,
    %c0_31 = arith.constant 0 : index
    %c0_32 = arith.constant 0 : index
    %c2 = arith.constant 2 : index
    %c0_33 = arith.constant 0 : index
    %52 = vector.load %arg2[%c0_31, %c0_32, %c2, %c0_33] : memref<1x8x16x16xf32, #tpu.memory_space<vmem>>, vector<1x8x1x16xf32>
    %53 = vector.shape_cast %52 : vector<1x8x1x16xf32> to vector<8x16xf32>
    %cst_34 = arith.constant dense<0.000000e+00> : vector<16x16xf32>
    %54 = tpu.matmul %0, %53, %cst_34 {dimension_numbers = #tpu.dot_dimension_numbers<[1], [0], [0], [1], [0, 0, 1, 1], [], []>} : vector<16x8xf32>, vector<8x16xf32>, vector<16x16xf32> -> vector<16x16xf32>
    %55 = vector.broadcast %1 : vector<16x1xf32> to vector<16x16xf32>
    %56 = arith.addf %54, %55 : vector<16x16xf32>
    %57 = vector.extract_strided_slice %56 {offsets = [0, 0], sizes = [8, 16], strides = [1, 1]} : vector<16x16xf32> to vector<8x16xf32>
    %cst_35 = arith.constant dense<0.000000e+00> : vector<8x32xf32>
    %58 = tpu.matmul %57, %8, %cst_35 {dimension_numbers = #tpu.dot_dimension_numbers<[1], [0], [0], [1], [0, 0, 1, 1], [], []>} : vector<8x16xf32>, vector<16x32xf32>, vector<8x32xf32> -> vector<8x32xf32>
    %59 = vector.extract_strided_slice %56 {offsets = [8, 0], sizes = [8, 16], strides = [1, 1]} : vector<16x16xf32> to vector<8x16xf32>
    %cst_36 = arith.constant dense<0.000000e+00> : vector<8x32xf32>
    %60 = tpu.matmul %59, %15, %cst_36 {dimension_numbers = #tpu.dot_dimension_numbers<[1], [0], [0], [1], [0, 0, 1, 1], [], []>} : vector<8x16xf32>, vector<16x32xf32>, vector<8x32xf32> -> vector<8x32xf32>
    %61 = arith.addf %58, %60 : vector<8x32xf32>
    %62 = vector.extract_strided_slice %61 {offsets = [0, 0], sizes = [4, 32], strides = [1, 1]} : vector<8x32xf32> to vector<4x32xf32>
    %c0_37 = arith.constant 0 : index
    %c0_38 = arith.constant 0 : index
    %c2_39 = arith.constant 2 : index
    %c0_40 = arith.constant 0 : index
    %63 = vector.load %arg5[%c0_37, %c0_38, %c2_39, %c0_40] : memref<1x4x16x64xf32, #tpu.memory_space<vmem>>, vector<1x4x1x32xf32>
    %64 = vector.shape_cast %63 : vector<1x4x1x32xf32> to vector<4x32xf32>
    %65 = vector.shape_cast %62 : vector<4x32xf32> to vector<1x4x1x32xf32>
    tpu.vector_store %arg5[%c0_37, %c0_38, %c2_39, %c0_40], %65 {strides = array<i32>} : memref<1x4x16x64xf32, #tpu.memory_space<vmem>>, vector<1x4x1x32xf32>,
    %66 = vector.extract_strided_slice %61 {offsets = [4, 0], sizes = [4, 32], strides = [1, 1]} : vector<8x32xf32> to vector<4x32xf32>
    %c0_41 = arith.constant 0 : index
    %c0_42 = arith.constant 0 : index
    %c2_43 = arith.constant 2 : index
    %c32_44 = arith.constant 32 : index
    %67 = vector.load %arg5[%c0_41, %c0_42, %c2_43, %c32_44] : memref<1x4x16x64xf32, #tpu.memory_space<vmem>>, vector<1x4x1x32xf32>
    %68 = vector.shape_cast %67 : vector<1x4x1x32xf32> to vector<4x32xf32>
    %69 = vector.shape_cast %66 : vector<4x32xf32> to vector<1x4x1x32xf32>
    tpu.vector_store %arg5[%c0_41, %c0_42, %c2_43, %c32_44], %69 {strides = array<i32>} : memref<1x4x16x64xf32, #tpu.memory_space<vmem>>, vector<1x4x1x32xf32>,
    %c0_45 = arith.constant 0 : index
    %c0_46 = arith.constant 0 : index
    %c3 = arith.constant 3 : index
    %c0_47 = arith.constant 0 : index
    %70 = vector.load %arg2[%c0_45, %c0_46, %c3, %c0_47] : memref<1x8x16x16xf32, #tpu.memory_space<vmem>>, vector<1x8x1x16xf32>
    %71 = vector.shape_cast %70 : vector<1x8x1x16xf32> to vector<8x16xf32>
    %cst_48 = arith.constant dense<0.000000e+00> : vector<16x16xf32>
    %72 = tpu.matmul %0, %71, %cst_48 {dimension_numbers = #tpu.dot_dimension_numbers<[1], [0], [0], [1], [0, 0, 1, 1], [], []>} : vector<16x8xf32>, vector<8x16xf32>, vector<16x16xf32> -> vector<16x16xf32>
    %73 = vector.broadcast %1 : vector<16x1xf32> to vector<16x16xf32>
    %74 = arith.addf %72, %73 : vector<16x16xf32>
    %75 = vector.extract_strided_slice %74 {offsets = [0, 0], sizes = [8, 16], strides = [1, 1]} : vector<16x16xf32> to vector<8x16xf32>
    %cst_49 = arith.constant dense<0.000000e+00> : vector<8x32xf32>
    %76 = tpu.matmul %75, %8, %cst_49 {dimension_numbers = #tpu.dot_dimension_numbers<[1], [0], [0], [1], [0, 0, 1, 1], [], []>} : vector<8x16xf32>, vector<16x32xf32>, vector<8x32xf32> -> vector<8x32xf32>
    %77 = vector.extract_strided_slice %74 {offsets = [8, 0], sizes = [8, 16], strides = [1, 1]} : vector<16x16xf32> to vector<8x16xf32>
    %cst_50 = arith.constant dense<0.000000e+00> : vector<8x32xf32>
    %78 = tpu.matmul %77, %15, %cst_50 {dimension_numbers = #tpu.dot_dimension_numbers<[1], [0], [0], [1], [0, 0, 1, 1], [], []>} : vector<8x16xf32>, vector<16x32xf32>, vector<8x32xf32> -> vector<8x32xf32>
    %79 = arith.addf %76, %78 : vector<8x32xf32>
    %80 = vector.extract_strided_slice %79 {offsets = [0, 0], sizes = [4, 32], strides = [1, 1]} : vector<8x32xf32> to vector<4x32xf32>
    %c0_51 = arith.constant 0 : index
    %c0_52 = arith.constant 0 : index
    %c3_53 = arith.constant 3 : index
    %c0_54 = arith.constant 0 : index
    %81 = vector.load %arg5[%c0_51, %c0_52, %c3_53, %c0_54] : memref<1x4x16x64xf32, #tpu.memory_space<vmem>>, vector<1x4x1x32xf32>
    %82 = vector.shape_cast %81 : vector<1x4x1x32xf32> to vector<4x32xf32>
    %83 = vector.shape_cast %80 : vector<4x32xf32> to vector<1x4x1x32xf32>
    tpu.vector_store %arg5[%c0_51, %c0_52, %c3_53, %c0_54], %83 {strides = array<i32>} : memref<1x4x16x64xf32, #tpu.memory_space<vmem>>, vector<1x4x1x32xf32>,
    %84 = vector.extract_strided_slice %79 {offsets = [4, 0], sizes = [4, 32], strides = [1, 1]} : vector<8x32xf32> to vector<4x32xf32>
    %c0_55 = arith.constant 0 : index
    %c0_56 = arith.constant 0 : index
    %c3_57 = arith.constant 3 : index
    %c32_58 = arith.constant 32 : index
    %85 = vector.load %arg5[%c0_55, %c0_56, %c3_57, %c32_58] : memref<1x4x16x64xf32, #tpu.memory_space<vmem>>, vector<1x4x1x32xf32>
    %86 = vector.shape_cast %85 : vector<1x4x1x32xf32> to vector<4x32xf32>
    %87 = vector.shape_cast %84 : vector<4x32xf32> to vector<1x4x1x32xf32>
    tpu.vector_store %arg5[%c0_55, %c0_56, %c3_57, %c32_58], %87 {strides = array<i32>} : memref<1x4x16x64xf32, #tpu.memory_space<vmem>>, vector<1x4x1x32xf32>,
    %c0_59 = arith.constant 0 : index
    %c0_60 = arith.constant 0 : index
    %c4 = arith.constant 4 : index
    %c0_61 = arith.constant 0 : index
    %88 = vector.load %arg2[%c0_59, %c0_60, %c4, %c0_61] : memref<1x8x16x16xf32, #tpu.memory_space<vmem>>, vector<1x8x1x16xf32>
    %89 = vector.shape_cast %88 : vector<1x8x1x16xf32> to vector<8x16xf32>
    %cst_62 = arith.constant dense<0.000000e+00> : vector<16x16xf32>
    %90 = tpu.matmul %0, %89, %cst_62 {dimension_numbers = #tpu.dot_dimension_numbers<[1], [0], [0], [1], [0, 0, 1, 1], [], []>} : vector<16x8xf32>, vector<8x16xf32>, vector<16x16xf32> -> vector<16x16xf32>
    %91 = vector.broadcast %1 : vector<16x1xf32> to vector<16x16xf32>
    %92 = arith.addf %90, %91 : vector<16x16xf32>
    %93 = vector.extract_strided_slice %92 {offsets = [0, 0], sizes = [8, 16], strides = [1, 1]} : vector<16x16xf32> to vector<8x16xf32>
    %cst_63 = arith.constant dense<0.000000e+00> : vector<8x32xf32>
    %94 = tpu.matmul %93, %8, %cst_63 {dimension_numbers = #tpu.dot_dimension_numbers<[1], [0], [0], [1], [0, 0, 1, 1], [], []>} : vector<8x16xf32>, vector<16x32xf32>, vector<8x32xf32> -> vector<8x32xf32>
    %95 = vector.extract_strided_slice %92 {offsets = [8, 0], sizes = [8, 16], strides = [1, 1]} : vector<16x16xf32> to vector<8x16xf32>
    %cst_64 = arith.constant dense<0.000000e+00> : vector<8x32xf32>
    %96 = tpu.matmul %95, %15, %cst_64 {dimension_numbers = #tpu.dot_dimension_numbers<[1], [0], [0], [1], [0, 0, 1, 1], [], []>} : vector<8x16xf32>, vector<16x32xf32>, vector<8x32xf32> -> vector<8x32xf32>
    %97 = arith.addf %94, %96 : vector<8x32xf32>
    %98 = vector.extract_strided_slice %97 {offsets = [0, 0], sizes = [4, 32], strides = [1, 1]} : vector<8x32xf32> to vector<4x32xf32>
    %c0_65 = arith.constant 0 : index
    %c0_66 = arith.constant 0 : index
    %c4_67 = arith.constant 4 : index
    %c0_68 = arith.constant 0 : index
    %99 = vector.load %arg5[%c0_65, %c0_66, %c4_67, %c0_68] : memref<1x4x16x64xf32, #tpu.memory_space<vmem>>, vector<1x4x1x32xf32>
    %100 = vector.shape_cast %99 : vector<1x4x1x32xf32> to vector<4x32xf32>
    %101 = vector.shape_cast %98 : vector<4x32xf32> to vector<1x4x1x32xf32>
    tpu.vector_store %arg5[%c0_65, %c0_66, %c4_67, %c0_68], %101 {strides = array<i32>} : memref<1x4x16x64xf32, #tpu.memory_space<vmem>>, vector<1x4x1x32xf32>,
    %102 = vector.extract_strided_slice %97 {offsets = [4, 0], sizes = [4, 32], strides = [1, 1]} : vector<8x32xf32> to vector<4x32xf32>
    %c0_69 = arith.constant 0 : index
    %c0_70 = arith.constant 0 : index
    %c4_71 = arith.constant 4 : index
    %c32_72 = arith.constant 32 : index
    %103 = vector.load %arg5[%c0_69, %c0_70, %c4_71, %c32_72] : memref<1x4x16x64xf32, #tpu.memory_space<vmem>>, vector<1x4x1x32xf32>
    %104 = vector.shape_cast %103 : vector<1x4x1x32xf32> to vector<4x32xf32>
    %105 = vector.shape_cast %102 : vector<4x32xf32> to vector<1x4x1x32xf32>
    tpu.vector_store %arg5[%c0_69, %c0_70, %c4_71, %c32_72], %105 {strides = array<i32>} : memref<1x4x16x64xf32, #tpu.memory_space<vmem>>, vector<1x4x1x32xf32>,
    %c0_73 = arith.constant 0 : index
    %c0_74 = arith.constant 0 : index
    %c5 = arith.constant 5 : index
    %c0_75 = arith.constant 0 : index
    %106 = vector.load %arg2[%c0_73, %c0_74, %c5, %c0_75] : memref<1x8x16x16xf32, #tpu.memory_space<vmem>>, vector<1x8x1x16xf32>
    %107 = vector.shape_cast %106 : vector<1x8x1x16xf32> to vector<8x16xf32>
    %cst_76 = arith.constant dense<0.000000e+00> : vector<16x16xf32>
    %108 = tpu.matmul %0, %107, %cst_76 {dimension_numbers = #tpu.dot_dimension_numbers<[1], [0], [0], [1], [0, 0, 1, 1], [], []>} : vector<16x8xf32>, vector<8x16xf32>, vector<16x16xf32> -> vector<16x16xf32>
    %109 = vector.broadcast %1 : vector<16x1xf32> to vector<16x16xf32>
    %110 = arith.addf %108, %109 : vector<16x16xf32>
    %111 = vector.extract_strided_slice %110 {offsets = [0, 0], sizes = [8, 16], strides = [1, 1]} : vector<16x16xf32> to vector<8x16xf32>
    %cst_77 = arith.constant dense<0.000000e+00> : vector<8x32xf32>
    %112 = tpu.matmul %111, %8, %cst_77 {dimension_numbers = #tpu.dot_dimension_numbers<[1], [0], [0], [1], [0, 0, 1, 1], [], []>} : vector<8x16xf32>, vector<16x32xf32>, vector<8x32xf32> -> vector<8x32xf32>
    %113 = vector.extract_strided_slice %110 {offsets = [8, 0], sizes = [8, 16], strides = [1, 1]} : vector<16x16xf32> to vector<8x16xf32>
    %cst_78 = arith.constant dense<0.000000e+00> : vector<8x32xf32>
    %114 = tpu.matmul %113, %15, %cst_78 {dimension_numbers = #tpu.dot_dimension_numbers<[1], [0], [0], [1], [0, 0, 1, 1], [], []>} : vector<8x16xf32>, vector<16x32xf32>, vector<8x32xf32> -> vector<8x32xf32>
    %115 = arith.addf %112, %114 : vector<8x32xf32>
    %116 = vector.extract_strided_slice %115 {offsets = [0, 0], sizes = [4, 32], strides = [1, 1]} : vector<8x32xf32> to vector<4x32xf32>
    %c0_79 = arith.constant 0 : index
    %c0_80 = arith.constant 0 : index
    %c5_81 = arith.constant 5 : index
    %c0_82 = arith.constant 0 : index
    %117 = vector.load %arg5[%c0_79, %c0_80, %c5_81, %c0_82] : memref<1x4x16x64xf32, #tpu.memory_space<vmem>>, vector<1x4x1x32xf32>
    %118 = vector.shape_cast %117 : vector<1x4x1x32xf32> to vector<4x32xf32>
    %119 = vector.shape_cast %116 : vector<4x32xf32> to vector<1x4x1x32xf32>
    tpu.vector_store %arg5[%c0_79, %c0_80, %c5_81, %c0_82], %119 {strides = array<i32>} : memref<1x4x16x64xf32, #tpu.memory_space<vmem>>, vector<1x4x1x32xf32>,
    %120 = vector.extract_strided_slice %115 {offsets = [4, 0], sizes = [4, 32], strides = [1, 1]} : vector<8x32xf32> to vector<4x32xf32>
    %c0_83 = arith.constant 0 : index
    %c0_84 = arith.constant 0 : index
    %c5_85 = arith.constant 5 : index
    %c32_86 = arith.constant 32 : index
    %121 = vector.load %arg5[%c0_83, %c0_84, %c5_85, %c32_86] : memref<1x4x16x64xf32, #tpu.memory_space<vmem>>, vector<1x4x1x32xf32>
    %122 = vector.shape_cast %121 : vector<1x4x1x32xf32> to vector<4x32xf32>
    %123 = vector.shape_cast %120 : vector<4x32xf32> to vector<1x4x1x32xf32>
    tpu.vector_store %arg5[%c0_83, %c0_84, %c5_85, %c32_86], %123 {strides = array<i32>} : memref<1x4x16x64xf32, #tpu.memory_space<vmem>>, vector<1x4x1x32xf32>,
    %c0_87 = arith.constant 0 : index
    %c0_88 = arith.constant 0 : index
    %c6 = arith.constant 6 : index
    %c0_89 = arith.constant 0 : index
    %124 = vector.load %arg2[%c0_87, %c0_88, %c6, %c0_89] : memref<1x8x16x16xf32, #tpu.memory_space<vmem>>, vector<1x8x1x16xf32>
    %125 = vector.shape_cast %124 : vector<1x8x1x16xf32> to vector<8x16xf32>
    %cst_90 = arith.constant dense<0.000000e+00> : vector<16x16xf32>
    %126 = tpu.matmul %0, %125, %cst_90 {dimension_numbers = #tpu.dot_dimension_numbers<[1], [0], [0], [1], [0, 0, 1, 1], [], []>} : vector<16x8xf32>, vector<8x16xf32>, vector<16x16xf32> -> vector<16x16xf32>
    %127 = vector.broadcast %1 : vector<16x1xf32> to vector<16x16xf32>
    %128 = arith.addf %126, %127 : vector<16x16xf32>
    %129 = vector.extract_strided_slice %128 {offsets = [0, 0], sizes = [8, 16], strides = [1, 1]} : vector<16x16xf32> to vector<8x16xf32>
    %cst_91 = arith.constant dense<0.000000e+00> : vector<8x32xf32>
    %130 = tpu.matmul %129, %8, %cst_91 {dimension_numbers = #tpu.dot_dimension_numbers<[1], [0], [0], [1], [0, 0, 1, 1], [], []>} : vector<8x16xf32>, vector<16x32xf32>, vector<8x32xf32> -> vector<8x32xf32>
    %131 = vector.extract_strided_slice %128 {offsets = [8, 0], sizes = [8, 16], strides = [1, 1]} : vector<16x16xf32> to vector<8x16xf32>
    %cst_92 = arith.constant dense<0.000000e+00> : vector<8x32xf32>
    %132 = tpu.matmul %131, %15, %cst_92 {dimension_numbers = #tpu.dot_dimension_numbers<[1], [0], [0], [1], [0, 0, 1, 1], [], []>} : vector<8x16xf32>, vector<16x32xf32>, vector<8x32xf32> -> vector<8x32xf32>
    %133 = arith.addf %130, %132 : vector<8x32xf32>
    %134 = vector.extract_strided_slice %133 {offsets = [0, 0], sizes = [4, 32], strides = [1, 1]} : vector<8x32xf32> to vector<4x32xf32>
    %c0_93 = arith.constant 0 : index
    %c0_94 = arith.constant 0 : index
    %c6_95 = arith.constant 6 : index
    %c0_96 = arith.constant 0 : index
    %135 = vector.load %arg5[%c0_93, %c0_94, %c6_95, %c0_96] : memref<1x4x16x64xf32, #tpu.memory_space<vmem>>, vector<1x4x1x32xf32>
    %136 = vector.shape_cast %135 : vector<1x4x1x32xf32> to vector<4x32xf32>
    %137 = vector.shape_cast %134 : vector<4x32xf32> to vector<1x4x1x32xf32>
    tpu.vector_store %arg5[%c0_93, %c0_94, %c6_95, %c0_96], %137 {strides = array<i32>} : memref<1x4x16x64xf32, #tpu.memory_space<vmem>>, vector<1x4x1x32xf32>,
    %138 = vector.extract_strided_slice %133 {offsets = [4, 0], sizes = [4, 32], strides = [1, 1]} : vector<8x32xf32> to vector<4x32xf32>
    %c0_97 = arith.constant 0 : index
    %c0_98 = arith.constant 0 : index
    %c6_99 = arith.constant 6 : index
    %c32_100 = arith.constant 32 : index
    %139 = vector.load %arg5[%c0_97, %c0_98, %c6_99, %c32_100] : memref<1x4x16x64xf32, #tpu.memory_space<vmem>>, vector<1x4x1x32xf32>
    %140 = vector.shape_cast %139 : vector<1x4x1x32xf32> to vector<4x32xf32>
    %141 = vector.shape_cast %138 : vector<4x32xf32> to vector<1x4x1x32xf32>
    tpu.vector_store %arg5[%c0_97, %c0_98, %c6_99, %c32_100], %141 {strides = array<i32>} : memref<1x4x16x64xf32, #tpu.memory_space<vmem>>, vector<1x4x1x32xf32>,
    %c0_101 = arith.constant 0 : index
    %c0_102 = arith.constant 0 : index
    %c7 = arith.constant 7 : index
    %c0_103 = arith.constant 0 : index
    %142 = vector.load %arg2[%c0_101, %c0_102, %c7, %c0_103] : memref<1x8x16x16xf32, #tpu.memory_space<vmem>>, vector<1x8x1x16xf32>
    %143 = vector.shape_cast %142 : vector<1x8x1x16xf32> to vector<8x16xf32>
    %cst_104 = arith.constant dense<0.000000e+00> : vector<16x16xf32>
    %144 = tpu.matmul %0, %143, %cst_104 {dimension_numbers = #tpu.dot_dimension_numbers<[1], [0], [0], [1], [0, 0, 1, 1], [], []>} : vector<16x8xf32>, vector<8x16xf32>, vector<16x16xf32> -> vector<16x16xf32>
    %145 = vector.broadcast %1 : vector<16x1xf32> to vector<16x16xf32>
    %146 = arith.addf %144, %145 : vector<16x16xf32>
    %147 = vector.extract_strided_slice %146 {offsets = [0, 0], sizes = [8, 16], strides = [1, 1]} : vector<16x16xf32> to vector<8x16xf32>
    %cst_105 = arith.constant dense<0.000000e+00> : vector<8x32xf32>
    %148 = tpu.matmul %147, %8, %cst_105 {dimension_numbers = #tpu.dot_dimension_numbers<[1], [0], [0], [1], [0, 0, 1, 1], [], []>} : vector<8x16xf32>, vector<16x32xf32>, vector<8x32xf32> -> vector<8x32xf32>
    %149 = vector.extract_strided_slice %146 {offsets = [8, 0], sizes = [8, 16], strides = [1, 1]} : vector<16x16xf32> to vector<8x16xf32>
    %cst_106 = arith.constant dense<0.000000e+00> : vector<8x32xf32>
    %150 = tpu.matmul %149, %15, %cst_106 {dimension_numbers = #tpu.dot_dimension_numbers<[1], [0], [0], [1], [0, 0, 1, 1], [], []>} : vector<8x16xf32>, vector<16x32xf32>, vector<8x32xf32> -> vector<8x32xf32>
    %151 = arith.addf %148, %150 : vector<8x32xf32>
    %152 = vector.extract_strided_slice %151 {offsets = [0, 0], sizes = [4, 32], strides = [1, 1]} : vector<8x32xf32> to vector<4x32xf32>
    %c0_107 = arith.constant 0 : index
    %c0_108 = arith.constant 0 : index
    %c7_109 = arith.constant 7 : index
    %c0_110 = arith.constant 0 : index
    %153 = vector.load %arg5[%c0_107, %c0_108, %c7_109, %c0_110] : memref<1x4x16x64xf32, #tpu.memory_space<vmem>>, vector<1x4x1x32xf32>
    %154 = vector.shape_cast %153 : vector<1x4x1x32xf32> to vector<4x32xf32>
    %155 = vector.shape_cast %152 : vector<4x32xf32> to vector<1x4x1x32xf32>
    tpu.vector_store %arg5[%c0_107, %c0_108, %c7_109, %c0_110], %155 {strides = array<i32>} : memref<1x4x16x64xf32, #tpu.memory_space<vmem>>, vector<1x4x1x32xf32>,
    %156 = vector.extract_strided_slice %151 {offsets = [4, 0], sizes = [4, 32], strides = [1, 1]} : vector<8x32xf32> to vector<4x32xf32>
    %c0_111 = arith.constant 0 : index
    %c0_112 = arith.constant 0 : index
    %c7_113 = arith.constant 7 : index
    %c32_114 = arith.constant 32 : index
    %157 = vector.load %arg5[%c0_111, %c0_112, %c7_113, %c32_114] : memref<1x4x16x64xf32, #tpu.memory_space<vmem>>, vector<1x4x1x32xf32>
    %158 = vector.shape_cast %157 : vector<1x4x1x32xf32> to vector<4x32xf32>
    %159 = vector.shape_cast %156 : vector<4x32xf32> to vector<1x4x1x32xf32>
    tpu.vector_store %arg5[%c0_111, %c0_112, %c7_113, %c32_114], %159 {strides = array<i32>} : memref<1x4x16x64xf32, #tpu.memory_space<vmem>>, vector<1x4x1x32xf32>,
    %c0_115 = arith.constant 0 : index
    %c0_116 = arith.constant 0 : index
    %c8 = arith.constant 8 : index
    %c0_117 = arith.constant 0 : index
    %160 = vector.load %arg2[%c0_115, %c0_116, %c8, %c0_117] : memref<1x8x16x16xf32, #tpu.memory_space<vmem>>, vector<1x8x1x16xf32>
    %161 = vector.shape_cast %160 : vector<1x8x1x16xf32> to vector<8x16xf32>
    %cst_118 = arith.constant dense<0.000000e+00> : vector<16x16xf32>
    %162 = tpu.matmul %0, %161, %cst_118 {dimension_numbers = #tpu.dot_dimension_numbers<[1], [0], [0], [1], [0, 0, 1, 1], [], []>} : vector<16x8xf32>, vector<8x16xf32>, vector<16x16xf32> -> vector<16x16xf32>
    %163 = vector.broadcast %1 : vector<16x1xf32> to vector<16x16xf32>
    %164 = arith.addf %162, %163 : vector<16x16xf32>
    %165 = vector.extract_strided_slice %164 {offsets = [0, 0], sizes = [8, 16], strides = [1, 1]} : vector<16x16xf32> to vector<8x16xf32>
    %cst_119 = arith.constant dense<0.000000e+00> : vector<8x32xf32>
    %166 = tpu.matmul %165, %8, %cst_119 {dimension_numbers = #tpu.dot_dimension_numbers<[1], [0], [0], [1], [0, 0, 1, 1], [], []>} : vector<8x16xf32>, vector<16x32xf32>, vector<8x32xf32> -> vector<8x32xf32>
    %167 = vector.extract_strided_slice %164 {offsets = [8, 0], sizes = [8, 16], strides = [1, 1]} : vector<16x16xf32> to vector<8x16xf32>
    %cst_120 = arith.constant dense<0.000000e+00> : vector<8x32xf32>
    %168 = tpu.matmul %167, %15, %cst_120 {dimension_numbers = #tpu.dot_dimension_numbers<[1], [0], [0], [1], [0, 0, 1, 1], [], []>} : vector<8x16xf32>, vector<16x32xf32>, vector<8x32xf32> -> vector<8x32xf32>
    %169 = arith.addf %166, %168 : vector<8x32xf32>
    %170 = vector.extract_strided_slice %169 {offsets = [0, 0], sizes = [4, 32], strides = [1, 1]} : vector<8x32xf32> to vector<4x32xf32>
    %c0_121 = arith.constant 0 : index
    %c0_122 = arith.constant 0 : index
    %c8_123 = arith.constant 8 : index
    %c0_124 = arith.constant 0 : index
    %171 = vector.load %arg5[%c0_121, %c0_122, %c8_123, %c0_124] : memref<1x4x16x64xf32, #tpu.memory_space<vmem>>, vector<1x4x1x32xf32>
    %172 = vector.shape_cast %171 : vector<1x4x1x32xf32> to vector<4x32xf32>
    %173 = vector.shape_cast %170 : vector<4x32xf32> to vector<1x4x1x32xf32>
    tpu.vector_store %arg5[%c0_121, %c0_122, %c8_123, %c0_124], %173 {strides = array<i32>} : memref<1x4x16x64xf32, #tpu.memory_space<vmem>>, vector<1x4x1x32xf32>,
    %174 = vector.extract_strided_slice %169 {offsets = [4, 0], sizes = [4, 32], strides = [1, 1]} : vector<8x32xf32> to vector<4x32xf32>
    %c0_125 = arith.constant 0 : index
    %c0_126 = arith.constant 0 : index
    %c8_127 = arith.constant 8 : index
    %c32_128 = arith.constant 32 : index
    %175 = vector.load %arg5[%c0_125, %c0_126, %c8_127, %c32_128] : memref<1x4x16x64xf32, #tpu.memory_space<vmem>>, vector<1x4x1x32xf32>
    %176 = vector.shape_cast %175 : vector<1x4x1x32xf32> to vector<4x32xf32>
    %177 = vector.shape_cast %174 : vector<4x32xf32> to vector<1x4x1x32xf32>
    tpu.vector_store %arg5[%c0_125, %c0_126, %c8_127, %c32_128], %177 {strides = array<i32>} : memref<1x4x16x64xf32, #tpu.memory_space<vmem>>, vector<1x4x1x32xf32>,
    %c0_129 = arith.constant 0 : index
    %c0_130 = arith.constant 0 : index
    %c9 = arith.constant 9 : index
    %c0_131 = arith.constant 0 : index
    %178 = vector.load %arg2[%c0_129, %c0_130, %c9, %c0_131] : memref<1x8x16x16xf32, #tpu.memory_space<vmem>>, vector<1x8x1x16xf32>
    %179 = vector.shape_cast %178 : vector<1x8x1x16xf32> to vector<8x16xf32>
    %cst_132 = arith.constant dense<0.000000e+00> : vector<16x16xf32>
    %180 = tpu.matmul %0, %179, %cst_132 {dimension_numbers = #tpu.dot_dimension_numbers<[1], [0], [0], [1], [0, 0, 1, 1], [], []>} : vector<16x8xf32>, vector<8x16xf32>, vector<16x16xf32> -> vector<16x16xf32>
    %181 = vector.broadcast %1 : vector<16x1xf32> to vector<16x16xf32>
    %182 = arith.addf %180, %181 : vector<16x16xf32>
    %183 = vector.extract_strided_slice %182 {offsets = [0, 0], sizes = [8, 16], strides = [1, 1]} : vector<16x16xf32> to vector<8x16xf32>
    %cst_133 = arith.constant dense<0.000000e+00> : vector<8x32xf32>
    %184 = tpu.matmul %183, %8, %cst_133 {dimension_numbers = #tpu.dot_dimension_numbers<[1], [0], [0], [1], [0, 0, 1, 1], [], []>} : vector<8x16xf32>, vector<16x32xf32>, vector<8x32xf32> -> vector<8x32xf32>
    %185 = vector.extract_strided_slice %182 {offsets = [8, 0], sizes = [8, 16], strides = [1, 1]} : vector<16x16xf32> to vector<8x16xf32>
    %cst_134 = arith.constant dense<0.000000e+00> : vector<8x32xf32>
    %186 = tpu.matmul %185, %15, %cst_134 {dimension_numbers = #tpu.dot_dimension_numbers<[1], [0], [0], [1], [0, 0, 1, 1], [], []>} : vector<8x16xf32>, vector<16x32xf32>, vector<8x32xf32> -> vector<8x32xf32>
    %187 = arith.addf %184, %186 : vector<8x32xf32>
    %188 = vector.extract_strided_slice %187 {offsets = [0, 0], sizes = [4, 32], strides = [1, 1]} : vector<8x32xf32> to vector<4x32xf32>
    %c0_135 = arith.constant 0 : index
    %c0_136 = arith.constant 0 : index
    %c9_137 = arith.constant 9 : index
    %c0_138 = arith.constant 0 : index
    %189 = vector.load %arg5[%c0_135, %c0_136, %c9_137, %c0_138] : memref<1x4x16x64xf32, #tpu.memory_space<vmem>>, vector<1x4x1x32xf32>
    %190 = vector.shape_cast %189 : vector<1x4x1x32xf32> to vector<4x32xf32>
    %191 = vector.shape_cast %188 : vector<4x32xf32> to vector<1x4x1x32xf32>
    tpu.vector_store %arg5[%c0_135, %c0_136, %c9_137, %c0_138], %191 {strides = array<i32>} : memref<1x4x16x64xf32, #tpu.memory_space<vmem>>, vector<1x4x1x32xf32>,
    %192 = vector.extract_strided_slice %187 {offsets = [4, 0], sizes = [4, 32], strides = [1, 1]} : vector<8x32xf32> to vector<4x32xf32>
    %c0_139 = arith.constant 0 : index
    %c0_140 = arith.constant 0 : index
    %c9_141 = arith.constant 9 : index
    %c32_142 = arith.constant 32 : index
    %193 = vector.load %arg5[%c0_139, %c0_140, %c9_141, %c32_142] : memref<1x4x16x64xf32, #tpu.memory_space<vmem>>, vector<1x4x1x32xf32>
    %194 = vector.shape_cast %193 : vector<1x4x1x32xf32> to vector<4x32xf32>
    %195 = vector.shape_cast %192 : vector<4x32xf32> to vector<1x4x1x32xf32>
    tpu.vector_store %arg5[%c0_139, %c0_140, %c9_141, %c32_142], %195 {strides = array<i32>} : memref<1x4x16x64xf32, #tpu.memory_space<vmem>>, vector<1x4x1x32xf32>,
    %c0_143 = arith.constant 0 : index
    %c0_144 = arith.constant 0 : index
    %c10 = arith.constant 10 : index
    %c0_145 = arith.constant 0 : index
    %196 = vector.load %arg2[%c0_143, %c0_144, %c10, %c0_145] : memref<1x8x16x16xf32, #tpu.memory_space<vmem>>, vector<1x8x1x16xf32>
    %197 = vector.shape_cast %196 : vector<1x8x1x16xf32> to vector<8x16xf32>
    %cst_146 = arith.constant dense<0.000000e+00> : vector<16x16xf32>
    %198 = tpu.matmul %0, %197, %cst_146 {dimension_numbers = #tpu.dot_dimension_numbers<[1], [0], [0], [1], [0, 0, 1, 1], [], []>} : vector<16x8xf32>, vector<8x16xf32>, vector<16x16xf32> -> vector<16x16xf32>
    %199 = vector.broadcast %1 : vector<16x1xf32> to vector<16x16xf32>
    %200 = arith.addf %198, %199 : vector<16x16xf32>
    %201 = vector.extract_strided_slice %200 {offsets = [0, 0], sizes = [8, 16], strides = [1, 1]} : vector<16x16xf32> to vector<8x16xf32>
    %cst_147 = arith.constant dense<0.000000e+00> : vector<8x32xf32>
    %202 = tpu.matmul %201, %8, %cst_147 {dimension_numbers = #tpu.dot_dimension_numbers<[1], [0], [0], [1], [0, 0, 1, 1], [], []>} : vector<8x16xf32>, vector<16x32xf32>, vector<8x32xf32> -> vector<8x32xf32>
    %203 = vector.extract_strided_slice %200 {offsets = [8, 0], sizes = [8, 16], strides = [1, 1]} : vector<16x16xf32> to vector<8x16xf32>
    %cst_148 = arith.constant dense<0.000000e+00> : vector<8x32xf32>
    %204 = tpu.matmul %203, %15, %cst_148 {dimension_numbers = #tpu.dot_dimension_numbers<[1], [0], [0], [1], [0, 0, 1, 1], [], []>} : vector<8x16xf32>, vector<16x32xf32>, vector<8x32xf32> -> vector<8x32xf32>
    %205 = arith.addf %202, %204 : vector<8x32xf32>
    %206 = vector.extract_strided_slice %205 {offsets = [0, 0], sizes = [4, 32], strides = [1, 1]} : vector<8x32xf32> to vector<4x32xf32>
    %c0_149 = arith.constant 0 : index
    %c0_150 = arith.constant 0 : index
    %c10_151 = arith.constant 10 : index
    %c0_152 = arith.constant 0 : index
    %207 = vector.load %arg5[%c0_149, %c0_150, %c10_151, %c0_152] : memref<1x4x16x64xf32, #tpu.memory_space<vmem>>, vector<1x4x1x32xf32>
    %208 = vector.shape_cast %207 : vector<1x4x1x32xf32> to vector<4x32xf32>
    %209 = vector.shape_cast %206 : vector<4x32xf32> to vector<1x4x1x32xf32>
    tpu.vector_store %arg5[%c0_149, %c0_150, %c10_151, %c0_152], %209 {strides = array<i32>} : memref<1x4x16x64xf32, #tpu.memory_space<vmem>>, vector<1x4x1x32xf32>,
    %210 = vector.extract_strided_slice %205 {offsets = [4, 0], sizes = [4, 32], strides = [1, 1]} : vector<8x32xf32> to vector<4x32xf32>
    %c0_153 = arith.constant 0 : index
    %c0_154 = arith.constant 0 : index
    %c10_155 = arith.constant 10 : index
    %c32_156 = arith.constant 32 : index
    %211 = vector.load %arg5[%c0_153, %c0_154, %c10_155, %c32_156] : memref<1x4x16x64xf32, #tpu.memory_space<vmem>>, vector<1x4x1x32xf32>
    %212 = vector.shape_cast %211 : vector<1x4x1x32xf32> to vector<4x32xf32>
    %213 = vector.shape_cast %210 : vector<4x32xf32> to vector<1x4x1x32xf32>
    tpu.vector_store %arg5[%c0_153, %c0_154, %c10_155, %c32_156], %213 {strides = array<i32>} : memref<1x4x16x64xf32, #tpu.memory_space<vmem>>, vector<1x4x1x32xf32>,
    %c0_157 = arith.constant 0 : index
    %c0_158 = arith.constant 0 : index
    %c11 = arith.constant 11 : index
    %c0_159 = arith.constant 0 : index
    %214 = vector.load %arg2[%c0_157, %c0_158, %c11, %c0_159] : memref<1x8x16x16xf32, #tpu.memory_space<vmem>>, vector<1x8x1x16xf32>
    %215 = vector.shape_cast %214 : vector<1x8x1x16xf32> to vector<8x16xf32>
    %cst_160 = arith.constant dense<0.000000e+00> : vector<16x16xf32>
    %216 = tpu.matmul %0, %215, %cst_160 {dimension_numbers = #tpu.dot_dimension_numbers<[1], [0], [0], [1], [0, 0, 1, 1], [], []>} : vector<16x8xf32>, vector<8x16xf32>, vector<16x16xf32> -> vector<16x16xf32>
    %217 = vector.broadcast %1 : vector<16x1xf32> to vector<16x16xf32>
    %218 = arith.addf %216, %217 : vector<16x16xf32>
    %219 = vector.extract_strided_slice %218 {offsets = [0, 0], sizes = [8, 16], strides = [1, 1]} : vector<16x16xf32> to vector<8x16xf32>
    %cst_161 = arith.constant dense<0.000000e+00> : vector<8x32xf32>
    %220 = tpu.matmul %219, %8, %cst_161 {dimension_numbers = #tpu.dot_dimension_numbers<[1], [0], [0], [1], [0, 0, 1, 1], [], []>} : vector<8x16xf32>, vector<16x32xf32>, vector<8x32xf32> -> vector<8x32xf32>
    %221 = vector.extract_strided_slice %218 {offsets = [8, 0], sizes = [8, 16], strides = [1, 1]} : vector<16x16xf32> to vector<8x16xf32>
    %cst_162 = arith.constant dense<0.000000e+00> : vector<8x32xf32>
    %222 = tpu.matmul %221, %15, %cst_162 {dimension_numbers = #tpu.dot_dimension_numbers<[1], [0], [0], [1], [0, 0, 1, 1], [], []>} : vector<8x16xf32>, vector<16x32xf32>, vector<8x32xf32> -> vector<8x32xf32>
    %223 = arith.addf %220, %222 : vector<8x32xf32>
    %224 = vector.extract_strided_slice %223 {offsets = [0, 0], sizes = [4, 32], strides = [1, 1]} : vector<8x32xf32> to vector<4x32xf32>
    %c0_163 = arith.constant 0 : index
    %c0_164 = arith.constant 0 : index
    %c11_165 = arith.constant 11 : index
    %c0_166 = arith.constant 0 : index
    %225 = vector.load %arg5[%c0_163, %c0_164, %c11_165, %c0_166] : memref<1x4x16x64xf32, #tpu.memory_space<vmem>>, vector<1x4x1x32xf32>
    %226 = vector.shape_cast %225 : vector<1x4x1x32xf32> to vector<4x32xf32>
    %227 = vector.shape_cast %224 : vector<4x32xf32> to vector<1x4x1x32xf32>
    tpu.vector_store %arg5[%c0_163, %c0_164, %c11_165, %c0_166], %227 {strides = array<i32>} : memref<1x4x16x64xf32, #tpu.memory_space<vmem>>, vector<1x4x1x32xf32>,
    %228 = vector.extract_strided_slice %223 {offsets = [4, 0], sizes = [4, 32], strides = [1, 1]} : vector<8x32xf32> to vector<4x32xf32>
    %c0_167 = arith.constant 0 : index
    %c0_168 = arith.constant 0 : index
    %c11_169 = arith.constant 11 : index
    %c32_170 = arith.constant 32 : index
    %229 = vector.load %arg5[%c0_167, %c0_168, %c11_169, %c32_170] : memref<1x4x16x64xf32, #tpu.memory_space<vmem>>, vector<1x4x1x32xf32>
    %230 = vector.shape_cast %229 : vector<1x4x1x32xf32> to vector<4x32xf32>
    %231 = vector.shape_cast %228 : vector<4x32xf32> to vector<1x4x1x32xf32>
    tpu.vector_store %arg5[%c0_167, %c0_168, %c11_169, %c32_170], %231 {strides = array<i32>} : memref<1x4x16x64xf32, #tpu.memory_space<vmem>>, vector<1x4x1x32xf32>,
    %c0_171 = arith.constant 0 : index
    %c0_172 = arith.constant 0 : index
    %c12 = arith.constant 12 : index
    %c0_173 = arith.constant 0 : index
    %232 = vector.load %arg2[%c0_171, %c0_172, %c12, %c0_173] : memref<1x8x16x16xf32, #tpu.memory_space<vmem>>, vector<1x8x1x16xf32>
    %233 = vector.shape_cast %232 : vector<1x8x1x16xf32> to vector<8x16xf32>
    %cst_174 = arith.constant dense<0.000000e+00> : vector<16x16xf32>
    %234 = tpu.matmul %0, %233, %cst_174 {dimension_numbers = #tpu.dot_dimension_numbers<[1], [0], [0], [1], [0, 0, 1, 1], [], []>} : vector<16x8xf32>, vector<8x16xf32>, vector<16x16xf32> -> vector<16x16xf32>
    %235 = vector.broadcast %1 : vector<16x1xf32> to vector<16x16xf32>
    %236 = arith.addf %234, %235 : vector<16x16xf32>
    %237 = vector.extract_strided_slice %236 {offsets = [0, 0], sizes = [8, 16], strides = [1, 1]} : vector<16x16xf32> to vector<8x16xf32>
    %cst_175 = arith.constant dense<0.000000e+00> : vector<8x32xf32>
    %238 = tpu.matmul %237, %8, %cst_175 {dimension_numbers = #tpu.dot_dimension_numbers<[1], [0], [0], [1], [0, 0, 1, 1], [], []>} : vector<8x16xf32>, vector<16x32xf32>, vector<8x32xf32> -> vector<8x32xf32>
    %239 = vector.extract_strided_slice %236 {offsets = [8, 0], sizes = [8, 16], strides = [1, 1]} : vector<16x16xf32> to vector<8x16xf32>
    %cst_176 = arith.constant dense<0.000000e+00> : vector<8x32xf32>
    %240 = tpu.matmul %239, %15, %cst_176 {dimension_numbers = #tpu.dot_dimension_numbers<[1], [0], [0], [1], [0, 0, 1, 1], [], []>} : vector<8x16xf32>, vector<16x32xf32>, vector<8x32xf32> -> vector<8x32xf32>
    %241 = arith.addf %238, %240 : vector<8x32xf32>
    %242 = vector.extract_strided_slice %241 {offsets = [0, 0], sizes = [4, 32], strides = [1, 1]} : vector<8x32xf32> to vector<4x32xf32>
    %c0_177 = arith.constant 0 : index
    %c0_178 = arith.constant 0 : index
    %c12_179 = arith.constant 12 : index
    %c0_180 = arith.constant 0 : index
    %243 = vector.load %arg5[%c0_177, %c0_178, %c12_179, %c0_180] : memref<1x4x16x64xf32, #tpu.memory_space<vmem>>, vector<1x4x1x32xf32>
    %244 = vector.shape_cast %243 : vector<1x4x1x32xf32> to vector<4x32xf32>
    %245 = vector.shape_cast %242 : vector<4x32xf32> to vector<1x4x1x32xf32>
    tpu.vector_store %arg5[%c0_177, %c0_178, %c12_179, %c0_180], %245 {strides = array<i32>} : memref<1x4x16x64xf32, #tpu.memory_space<vmem>>, vector<1x4x1x32xf32>,
    %246 = vector.extract_strided_slice %241 {offsets = [4, 0], sizes = [4, 32], strides = [1, 1]} : vector<8x32xf32> to vector<4x32xf32>
    %c0_181 = arith.constant 0 : index
    %c0_182 = arith.constant 0 : index
    %c12_183 = arith.constant 12 : index
    %c32_184 = arith.constant 32 : index
    %247 = vector.load %arg5[%c0_181, %c0_182, %c12_183, %c32_184] : memref<1x4x16x64xf32, #tpu.memory_space<vmem>>, vector<1x4x1x32xf32>
    %248 = vector.shape_cast %247 : vector<1x4x1x32xf32> to vector<4x32xf32>
    %249 = vector.shape_cast %246 : vector<4x32xf32> to vector<1x4x1x32xf32>
    tpu.vector_store %arg5[%c0_181, %c0_182, %c12_183, %c32_184], %249 {strides = array<i32>} : memref<1x4x16x64xf32, #tpu.memory_space<vmem>>, vector<1x4x1x32xf32>,
    %c0_185 = arith.constant 0 : index
    %c0_186 = arith.constant 0 : index
    %c13 = arith.constant 13 : index
    %c0_187 = arith.constant 0 : index
    %250 = vector.load %arg2[%c0_185, %c0_186, %c13, %c0_187] : memref<1x8x16x16xf32, #tpu.memory_space<vmem>>, vector<1x8x1x16xf32>
    %251 = vector.shape_cast %250 : vector<1x8x1x16xf32> to vector<8x16xf32>
    %cst_188 = arith.constant dense<0.000000e+00> : vector<16x16xf32>
    %252 = tpu.matmul %0, %251, %cst_188 {dimension_numbers = #tpu.dot_dimension_numbers<[1], [0], [0], [1], [0, 0, 1, 1], [], []>} : vector<16x8xf32>, vector<8x16xf32>, vector<16x16xf32> -> vector<16x16xf32>
    %253 = vector.broadcast %1 : vector<16x1xf32> to vector<16x16xf32>
    %254 = arith.addf %252, %253 : vector<16x16xf32>
    %255 = vector.extract_strided_slice %254 {offsets = [0, 0], sizes = [8, 16], strides = [1, 1]} : vector<16x16xf32> to vector<8x16xf32>
    %cst_189 = arith.constant dense<0.000000e+00> : vector<8x32xf32>
    %256 = tpu.matmul %255, %8, %cst_189 {dimension_numbers = #tpu.dot_dimension_numbers<[1], [0], [0], [1], [0, 0, 1, 1], [], []>} : vector<8x16xf32>, vector<16x32xf32>, vector<8x32xf32> -> vector<8x32xf32>
    %257 = vector.extract_strided_slice %254 {offsets = [8, 0], sizes = [8, 16], strides = [1, 1]} : vector<16x16xf32> to vector<8x16xf32>
    %cst_190 = arith.constant dense<0.000000e+00> : vector<8x32xf32>
    %258 = tpu.matmul %257, %15, %cst_190 {dimension_numbers = #tpu.dot_dimension_numbers<[1], [0], [0], [1], [0, 0, 1, 1], [], []>} : vector<8x16xf32>, vector<16x32xf32>, vector<8x32xf32> -> vector<8x32xf32>
    %259 = arith.addf %256, %258 : vector<8x32xf32>
    %260 = vector.extract_strided_slice %259 {offsets = [0, 0], sizes = [4, 32], strides = [1, 1]} : vector<8x32xf32> to vector<4x32xf32>
    %c0_191 = arith.constant 0 : index
    %c0_192 = arith.constant 0 : index
    %c13_193 = arith.constant 13 : index
    %c0_194 = arith.constant 0 : index
    %261 = vector.load %arg5[%c0_191, %c0_192, %c13_193, %c0_194] : memref<1x4x16x64xf32, #tpu.memory_space<vmem>>, vector<1x4x1x32xf32>
    %262 = vector.shape_cast %261 : vector<1x4x1x32xf32> to vector<4x32xf32>
    %263 = vector.shape_cast %260 : vector<4x32xf32> to vector<1x4x1x32xf32>
    tpu.vector_store %arg5[%c0_191, %c0_192, %c13_193, %c0_194], %263 {strides = array<i32>} : memref<1x4x16x64xf32, #tpu.memory_space<vmem>>, vector<1x4x1x32xf32>,
    %264 = vector.extract_strided_slice %259 {offsets = [4, 0], sizes = [4, 32], strides = [1, 1]} : vector<8x32xf32> to vector<4x32xf32>
    %c0_195 = arith.constant 0 : index
    %c0_196 = arith.constant 0 : index
    %c13_197 = arith.constant 13 : index
    %c32_198 = arith.constant 32 : index
    %265 = vector.load %arg5[%c0_195, %c0_196, %c13_197, %c32_198] : memref<1x4x16x64xf32, #tpu.memory_space<vmem>>, vector<1x4x1x32xf32>
    %266 = vector.shape_cast %265 : vector<1x4x1x32xf32> to vector<4x32xf32>
    %267 = vector.shape_cast %264 : vector<4x32xf32> to vector<1x4x1x32xf32>
    tpu.vector_store %arg5[%c0_195, %c0_196, %c13_197, %c32_198], %267 {strides = array<i32>} : memref<1x4x16x64xf32, #tpu.memory_space<vmem>>, vector<1x4x1x32xf32>,
    %c0_199 = arith.constant 0 : index
    %c0_200 = arith.constant 0 : index
    %c14 = arith.constant 14 : index
    %c0_201 = arith.constant 0 : index
    %268 = vector.load %arg2[%c0_199, %c0_200, %c14, %c0_201] : memref<1x8x16x16xf32, #tpu.memory_space<vmem>>, vector<1x8x1x16xf32>
    %269 = vector.shape_cast %268 : vector<1x8x1x16xf32> to vector<8x16xf32>
    %cst_202 = arith.constant dense<0.000000e+00> : vector<16x16xf32>
    %270 = tpu.matmul %0, %269, %cst_202 {dimension_numbers = #tpu.dot_dimension_numbers<[1], [0], [0], [1], [0, 0, 1, 1], [], []>} : vector<16x8xf32>, vector<8x16xf32>, vector<16x16xf32> -> vector<16x16xf32>
    %271 = vector.broadcast %1 : vector<16x1xf32> to vector<16x16xf32>
    %272 = arith.addf %270, %271 : vector<16x16xf32>
    %273 = vector.extract_strided_slice %272 {offsets = [0, 0], sizes = [8, 16], strides = [1, 1]} : vector<16x16xf32> to vector<8x16xf32>
    %cst_203 = arith.constant dense<0.000000e+00> : vector<8x32xf32>
    %274 = tpu.matmul %273, %8, %cst_203 {dimension_numbers = #tpu.dot_dimension_numbers<[1], [0], [0], [1], [0, 0, 1, 1], [], []>} : vector<8x16xf32>, vector<16x32xf32>, vector<8x32xf32> -> vector<8x32xf32>
    %275 = vector.extract_strided_slice %272 {offsets = [8, 0], sizes = [8, 16], strides = [1, 1]} : vector<16x16xf32> to vector<8x16xf32>
    %cst_204 = arith.constant dense<0.000000e+00> : vector<8x32xf32>
    %276 = tpu.matmul %275, %15, %cst_204 {dimension_numbers = #tpu.dot_dimension_numbers<[1], [0], [0], [1], [0, 0, 1, 1], [], []>} : vector<8x16xf32>, vector<16x32xf32>, vector<8x32xf32> -> vector<8x32xf32>
    %277 = arith.addf %274, %276 : vector<8x32xf32>
    %278 = vector.extract_strided_slice %277 {offsets = [0, 0], sizes = [4, 32], strides = [1, 1]} : vector<8x32xf32> to vector<4x32xf32>
    %c0_205 = arith.constant 0 : index
    %c0_206 = arith.constant 0 : index
    %c14_207 = arith.constant 14 : index
    %c0_208 = arith.constant 0 : index
    %279 = vector.load %arg5[%c0_205, %c0_206, %c14_207, %c0_208] : memref<1x4x16x64xf32, #tpu.memory_space<vmem>>, vector<1x4x1x32xf32>
    %280 = vector.shape_cast %279 : vector<1x4x1x32xf32> to vector<4x32xf32>
    %281 = vector.shape_cast %278 : vector<4x32xf32> to vector<1x4x1x32xf32>
    tpu.vector_store %arg5[%c0_205, %c0_206, %c14_207, %c0_208], %281 {strides = array<i32>} : memref<1x4x16x64xf32, #tpu.memory_space<vmem>>, vector<1x4x1x32xf32>,
    %282 = vector.extract_strided_slice %277 {offsets = [4, 0], sizes = [4, 32], strides = [1, 1]} : vector<8x32xf32> to vector<4x32xf32>
    %c0_209 = arith.constant 0 : index
    %c0_210 = arith.constant 0 : index
    %c14_211 = arith.constant 14 : index
    %c32_212 = arith.constant 32 : index
    %283 = vector.load %arg5[%c0_209, %c0_210, %c14_211, %c32_212] : memref<1x4x16x64xf32, #tpu.memory_space<vmem>>, vector<1x4x1x32xf32>
    %284 = vector.shape_cast %283 : vector<1x4x1x32xf32> to vector<4x32xf32>
    %285 = vector.shape_cast %282 : vector<4x32xf32> to vector<1x4x1x32xf32>
    tpu.vector_store %arg5[%c0_209, %c0_210, %c14_211, %c32_212], %285 {strides = array<i32>} : memref<1x4x16x64xf32, #tpu.memory_space<vmem>>, vector<1x4x1x32xf32>,
    %c0_213 = arith.constant 0 : index
    %c0_214 = arith.constant 0 : index
    %c15 = arith.constant 15 : index
    %c0_215 = arith.constant 0 : index
    %286 = vector.load %arg2[%c0_213, %c0_214, %c15, %c0_215] : memref<1x8x16x16xf32, #tpu.memory_space<vmem>>, vector<1x8x1x16xf32>
    %287 = vector.shape_cast %286 : vector<1x8x1x16xf32> to vector<8x16xf32>
    %cst_216 = arith.constant dense<0.000000e+00> : vector<16x16xf32>
    %288 = tpu.matmul %0, %287, %cst_216 {dimension_numbers = #tpu.dot_dimension_numbers<[1], [0], [0], [1], [0, 0, 1, 1], [], []>} : vector<16x8xf32>, vector<8x16xf32>, vector<16x16xf32> -> vector<16x16xf32>
    %289 = vector.broadcast %1 : vector<16x1xf32> to vector<16x16xf32>
    %290 = arith.addf %288, %289 : vector<16x16xf32>
    %291 = vector.extract_strided_slice %290 {offsets = [0, 0], sizes = [8, 16], strides = [1, 1]} : vector<16x16xf32> to vector<8x16xf32>
    %cst_217 = arith.constant dense<0.000000e+00> : vector<8x32xf32>
    %292 = tpu.matmul %291, %8, %cst_217 {dimension_numbers = #tpu.dot_dimension_numbers<[1], [0], [0], [1], [0, 0, 1, 1], [], []>} : vector<8x16xf32>, vector<16x32xf32>, vector<8x32xf32> -> vector<8x32xf32>
    %293 = vector.extract_strided_slice %290 {offsets = [8, 0], sizes = [8, 16], strides = [1, 1]} : vector<16x16xf32> to vector<8x16xf32>
    %cst_218 = arith.constant dense<0.000000e+00> : vector<8x32xf32>
    %294 = tpu.matmul %293, %15, %cst_218 {dimension_numbers = #tpu.dot_dimension_numbers<[1], [0], [0], [1], [0, 0, 1, 1], [], []>} : vector<8x16xf32>, vector<16x32xf32>, vector<8x32xf32> -> vector<8x32xf32>
    %295 = arith.addf %292, %294 : vector<8x32xf32>
    %296 = vector.extract_strided_slice %295 {offsets = [0, 0], sizes = [4, 32], strides = [1, 1]} : vector<8x32xf32> to vector<4x32xf32>
    %c0_219 = arith.constant 0 : index
    %c0_220 = arith.constant 0 : index
    %c15_221 = arith.constant 15 : index
    %c0_222 = arith.constant 0 : index
    %297 = vector.load %arg5[%c0_219, %c0_220, %c15_221, %c0_222] : memref<1x4x16x64xf32, #tpu.memory_space<vmem>>, vector<1x4x1x32xf32>
    %298 = vector.shape_cast %297 : vector<1x4x1x32xf32> to vector<4x32xf32>
    %299 = vector.shape_cast %296 : vector<4x32xf32> to vector<1x4x1x32xf32>
    tpu.vector_store %arg5[%c0_219, %c0_220, %c15_221, %c0_222], %299 {strides = array<i32>} : memref<1x4x16x64xf32, #tpu.memory_space<vmem>>, vector<1x4x1x32xf32>,
    %300 = vector.extract_strided_slice %295 {offsets = [4, 0], sizes = [4, 32], strides = [1, 1]} : vector<8x32xf32> to vector<4x32xf32>
    %c0_223 = arith.constant 0 : index
    %c0_224 = arith.constant 0 : index
    %c15_225 = arith.constant 15 : index
    %c32_226 = arith.constant 32 : index
    %301 = vector.load %arg5[%c0_223, %c0_224, %c15_225, %c32_226] : memref<1x4x16x64xf32, #tpu.memory_space<vmem>>, vector<1x4x1x32xf32>
    %302 = vector.shape_cast %301 : vector<1x4x1x32xf32> to vector<4x32xf32>
    %303 = vector.shape_cast %300 : vector<4x32xf32> to vector<1x4x1x32xf32>
    tpu.vector_store %arg5[%c0_223, %c0_224, %c15_225, %c32_226], %303 {strides = array<i32>} : memref<1x4x16x64xf32, #tpu.memory_space<vmem>>, vector<1x4x1x32xf32>,
    return
  }
  func.func @transform_0(%arg0: i32, %arg1: i32) -> (i32, i32, i32, i32) {
    %c0_i32 = arith.constant 0 : i32
    %c0_i32_0 = arith.constant 0 : i32
    %c0_i32_1 = arith.constant 0 : i32
    return %arg0, %c0_i32, %arg1, %c0_i32_0 : i32, i32, i32, i32
  }
  func.func @transform_1(%arg0: i32, %arg1: i32) -> (i32, i32) {
    %c0_i32 = arith.constant 0 : i32
    %c0_i32_0 = arith.constant 0 : i32
    %c0_i32_1 = arith.constant 0 : i32
    return %c0_i32, %c0_i32_0 : i32, i32
  }
  func.func @transform_2(%arg0: i32, %arg1: i32) -> (i32, i32) {
    %c0_i32 = arith.constant 0 : i32
    %c0_i32_0 = arith.constant 0 : i32
    %c0_i32_1 = arith.constant 0 : i32
    return %c0_i32, %c0_i32_0 : i32, i32
  }
  func.func @transform_3(%arg0: i32, %arg1: i32) -> (i32, i32, i32, i32) {
    %c0_i32 = arith.constant 0 : i32
    %c0_i32_0 = arith.constant 0 : i32
    %c0_i32_1 = arith.constant 0 : i32
    return %arg0, %c0_i32, %arg1, %c0_i32_0 : i32, i32, i32, i32
  }
}

</mosaic_0001>

<bundles_post_ra>
// kernel: tpu_custom_call.1
= control target key start
LH: loop header
LB: loop body
LE: loop exit
PB: predicated region body
PF: predicated region fallthrough
CT: control target
= control target key end

     0   :  { %8 = vsyncpa [#allocation3], 0  ;;  %s4013_s0 = inlined_call_operand.hbm [shape: f32[2,8,16,16], index: 0, kind: input, shape index: {}]   ;;  %s4014_s1 = inlined_call_operand.vmem [shape: f32[16,8], index: 1, kind: input, shape index: {}]   ;;  %s4015_s2 = inlined_call_operand.vmem [shape: f32[16,1], index: 2, kind: input, shape index: {}]   ;;  %s4016_s3 = inlined_call_operand.hbm [shape: f32[2,4,16,64], index: 3, kind: output, shape index: {}]  }
   0x1   :  { %10 = vsyncpa [#allocation3 + $0x1], 0 }
   0x2   :  { %11 = vsyncpa [#allocation4], 0 }
   0x3   :  { %13 = vsyncpa [#allocation4 + $0x1], 0  ;;  %s2968_s12 = smov 0   ;;  %s2970_s13 = smov 0  }
   0x4   :  { %s2972_s14 = smov 0   ;;  %s2974_s15 = smov 0  }
   0x5   :  { %s2976_s16 = smov 0   ;;  %s2978_s17 = smov 0  }
   0x6 LB: > { %s2608_s18 = sadd.s32 4294967295, %s2939_s17   ;;  %s2609_s19 = sadd.s32 4294967294, %s2939_s17   ;;  %s2939_s17 = sphi %s2978_s17, %s19_s17   ;;  %s2935_s16 = sphi %s2976_s16, %s4033_s16   ;;  %s2931_s15 = sphi %s2974_s15, %s4032_s15   ;;  %s2927_s14 = sphi %s2972_s14, %s4031_s14   ;;  %s2923_s13 = sphi %s2970_s13, %s4030_s13   ;;  %s2919_s12 = sphi %s2968_s12, %s4029_s12  }
   0x7   : > { %s31_s20 = sadd.s32 1, %s2935_s16  ;;  %s40_s21 = sadd.s32 1, %s2927_s14 }
   0x8   : > { %p33_p0 = scmp.ge.s32.totalorder %s31_s20, 2  ;;  %p47_p1 = scmp.ne.s32.totalorder %s2927_s14, %s2923_s13 }
   0x9   : > { %p48_p2 = scmp.eq.s32.totalorder %s2939_s17, 0  ;;  %p53_p3 = scmp.ne.s32.totalorder %s2923_s13, %s2919_s12 }
   0xa   : > { %s4035_s20 = smov (%p33_p0, %s31_s20), 0  ;;  %p54_p5 = scmp.eq.s32.totalorder %s2608_s18, 0 }
   0xb   : > { %p3009_p4 = por %p48_p2, %p47_p1  ;;  %s35_s23 = ssub.s32 %s2935_s16, %s4035_s20 }
   0xc   : > { %p121_p6 = scmp.eq.s32.totalorder %s2608_s18, 1  ;;  %p38_p7 = scmp.eq.s32.totalorder %s35_s23, 0 }
   0xd   : > { %p3015_p8 = por %p54_p5, %p53_p3  ;;  %p127_p10 = scmp.eq.s32.totalorder %s2609_s19, 1 }
   0xe   : > { %p3019_p9 = por %p121_p6, %p47_p1  ;;  %p2611_p12 = scmp.ge.s32.totalorder %s2939_s17, 2 }
   0xf   : > { %s3024_s26 = scalar_select %p38_p7, %s2927_s14, %s40_s21  }
  0x10   : > { %p3026_p11 = por %p127_p10, %p53_p3  ;;  %p2769_p13 = scmp.lt.s32.totalorder %s2939_s17, 2 }
  0x11   : > { %s153_s28 = sand.u32 1, %s2927_s14   ;;  %s2755_s30 = sshll.u32 %s2935_s16, 7 }
  0x12   : > { %s2612_s29 = sshll.u32 %s153_s28, 7  ;;  %s164_s6 = scalar_lea.hbm %s4013_s0, %s2755_s30 }
  0x13   : > { %s157_s7 = scalar_lea.vmem [#allocation2], %s2612_s29  ;;  %s165_s9 = sshll.u32 %s164_s6, 4  ;;  %s166_s9 = int_to_ptr.hbm [resolvable:$true] %s165_s9 }
  0x14   : > { %s167_s8 = sshll.u32 %s157_s7, 4  ;;  %p2762_p0 = pnand %p2769_p13, %p3009_p4  ;;  %s168_s8 = int_to_ptr.vmem [resolvable:$true] %s167_s8 }
  0x15   : > { %p2615_p1 = scmp.ge.s32.totalorder %s2939_s17, 1  ;;  %s154_s10 = scalar_lea.sflag [#allocation3], %s153_s28 }
  0x16   : > { %s2941_s11 = smov 128   ;;  %s2942_s18 = smov 8  }
  0x17   : > { %2764 = dma.hbm_to_vmem [thread:$0]  (!%p2762_p0), %s166_s9, 2048, %s168_s8, %s154_s10, %s2941_s11, %s2941_s11, %s2942_s18  }
  0x18   : > { %p175_p2 = scmp.lt.s32.totalorder %s2939_s17, 3 }
  0x1a   : > { %p176_p3 = pnand %p2615_p1, %p175_p2 }
  0x1b   : > { %s3042_s19 = sand.u32 (!%p176_p3), 1, %s2923_s13  }
  0x1c   : > { %179 = sbr.rel (%p176_p3) target bundleno = 732 (0x2dc), region = 32  ;;  %s2616_s21 = sshll.u32 (!%p176_p3), %s3042_s19, 7 }
  0x1d   : > { %s182_s23 = scalar_lea.sflag (!%p176_p3), [#allocation3], %s3042_s19  ;;  %s3046_s29 = scalar_lea.vmem (!%p176_p3), [#allocation2], %s2616_s21 }
  0x21   : > { %2910 = dma.done.wait (%p3015_p8), %s182_s23, 2048  }
  0x22   : > { %2912 = vsyncadd (%p3015_p8), %s182_s23, 4294965248  ;;  %v2943_v0 = vmov 0   ;;  %vm263_vm0 = vcmask 1041409   ;;  %vm266_vm1 = vcmask 1042434   ;;  %vm269_vm2 = vcmask 1043459   ;;  %v3075_v33 = vld [vmem:[%s4014_s1] sm:$0xff] }
  0x23   : > { %2826 = vset.pattern.permute.xlu0 %v2943_v0  ;;  %vm272_vm3 = vcmask 1044484   ;;  %vm275_vm4 = vcmask 1045509   ;;  %vm278_vm5 = vcmask 1046534   ;;  %vm281_vm6 = vcmask 1047559   ;;  %v236_v1 = vld [vmem:[%s3046_s29] sm:$0x1] }
  0x24   : > { %v237_v2 = vld [vmem:[%s3046_s29 + $0x10] sm:$0x1]  ;;  %v238_v3 = vld [vmem:[%s3046_s29 + $0x20] sm:$0x1]  ;;  %v403_v14 = vld [vmem:[%s3046_s29 + $0x1] sm:$0x1] }
  0x25   : > { %v239_v4 = vld [vmem:[%s3046_s29 + $0x30] sm:$0x1]  ;;  %v240_v5 = vld [vmem:[%s3046_s29 + $0x40] sm:$0x1]  ;;  %v262_v9 = vrot.slane %v237_v2, 7  ;;  %v265_v10 = vrot.slane %v238_v3, 6 }
  0x26   : > { %v241_v6 = vld [vmem:[%s3046_s29 + $0x50] sm:$0x1]  ;;  %v242_v7 = vld [vmem:[%s3046_s29 + $0x60] sm:$0x1]  ;;  %v268_v11 = vrot.slane %v239_v4, 5  ;;  %v271_v12 = vrot.slane %v240_v5, 4 }
  0x27   : > { %v243_v8 = vld [vmem:[%s3046_s29 + $0x70] sm:$0x1]  ;;  %v274_v13 = vrot.slane %v241_v6, 3  ;;  %vm284_vm7 = vcmask 64512   ;;  %v264_v15 = vsel %vm263_vm0, %v262_v9, %v236_v1  ;;  %v277_v16 = vrot.slane %v242_v7, 2  ;;  %v213_v34 = vld [vmem:[%s4015_s2] sm:$0xff] }
  0x28   : > { %v280_v17 = vrot.slane %v243_v8, 1  ;;  %v404_v18 = vld [vmem:[%s3046_s29 + $0x11] sm:$0x1]  ;;  %v405_v19 = vld [vmem:[%s3046_s29 + $0x21] sm:$0x1]  ;;  %v267_v20 = vsel %vm266_vm1, %v265_v10, %v264_v15  ;;  %246 = vperm.xlu0 %2826, %v213_v34   ;;  %vm314_vm12 = vcmask 130048  }
  0x29   : > { %v406_v21 = vld [vmem:[%s3046_s29 + $0x31] sm:$0x1]  ;;  %v407_v22 = vld [vmem:[%s3046_s29 + $0x41] sm:$0x1]  ;;  %v270_v24 = vsel %vm269_vm2, %v268_v11, %v267_v20  ;;  %v419_v27 = vrot.slane %v404_v18, 7  ;;  %v421_v28 = vrot.slane %v405_v19, 6 }
  0x2a   : > { %v408_v23 = vld [vmem:[%s3046_s29 + $0x51] sm:$0x1]  ;;  %v409_v25 = vld [vmem:[%s3046_s29 + $0x61] sm:$0x1]  ;;  %v273_v29 = vsel %vm272_vm3, %v271_v12, %v270_v24  ;;  %v423_v30 = vrot.slane %v406_v21, 5  ;;  %v425_v31 = vrot.slane %v407_v22, 4 }
  0x2b   : > { %v410_v26 = vld [vmem:[%s3046_s29 + $0x71] sm:$0x1]  ;;  %v427_v32 = vrot.slane %v408_v23, 3  ;;  %v276_v35 = vsel %vm275_vm4, %v274_v13, %v273_v29  ;;  %v420_v36 = vsel %vm263_vm0, %v419_v27, %v403_v14  ;;  %v429_v37 = vrot.slane %v409_v25, 2  ;;  %v543_v39 = vld [vmem:[%s3046_s29 + $0x2] sm:$0x1] }
  0x2c   : > { %v431_v38 = vrot.slane %v410_v26, 1  ;;  %v544_v40 = vld [vmem:[%s3046_s29 + $0x12] sm:$0x1]  ;;  %v279_v41 = vsel %vm278_vm5, %v277_v16, %v276_v35  ;;  %v422_v42 = vsel %vm266_vm1, %v421_v28, %v420_v36  ;;  %v545_v43 = vld [vmem:[%s3046_s29 + $0x22] sm:$0x1]  ;;  %s2617_s8 = sshll.u32 %s3042_s19, 6 }
  0x2d   : > { %v546_v44 = vld [vmem:[%s3046_s29 + $0x32] sm:$0x1]  ;;  %v547_v45 = vld [vmem:[%s3046_s29 + $0x42] sm:$0x1]  ;;  %v282_v46 = vsel %vm281_vm6, %v280_v17, %v279_v41  ;;  %v424_v47 = vsel %vm269_vm2, %v423_v30, %v422_v42  ;;  %v559_v52 = vrot.slane %v544_v40, 7  ;;  %v561_v53 = vrot.slane %v545_v43, 6 }
  0x2e   : > { %v548_v48 = vld [vmem:[%s3046_s29 + $0x52] sm:$0x1]  ;;  %v549_v49 = vld [vmem:[%s3046_s29 + $0x62] sm:$0x1]  ;;  %306 = vmatpush.msra.mxu0 %v282_v46  ;;  %v426_v51 = vsel %vm272_vm3, %v425_v31, %v424_v47  ;;  %v563_v54 = vrot.slane %v546_v44, 5  ;;  %v565_v58 = vrot.slane %v547_v45, 4 }
  0x2f   : > { %v550_v50 = vld [vmem:[%s3046_s29 + $0x72] sm:$0x1]  ;;  %v823_v55 = vld [vmem:[%s3046_s29 + $0x4] sm:$0x1]  ;;  %v428_v56 = vsel %vm275_vm4, %v427_v32, %v426_v51  ;;  %2622 = vmatmul.msk.f32.vlgmr.msra.gmra.mxu0 %vm284_vm7, %v3075_v33  ;;  %v567_v59 = vrot.slane %v548_v48, 3  ;;  %v569_v60 = vrot.slane %v549_v49, 2  ;;  %v560_v63 = vsel %vm263_vm0, %v559_v52, %v543_v39 }
  0x30   : > { %v214_v57 = vld [vmem:[%s4015_s2 + $0x8] sm:$0xff]  ;;  %v824_v61 = vld [vmem:[%s3046_s29 + $0x14] sm:$0x1]  ;;  %v430_v62 = vsel %vm278_vm5, %v429_v37, %v428_v56  ;;  %v571_v0 = vrot.slane %v550_v50, 1  ;;  %v562_v5 = vsel %vm266_vm1, %v561_v53, %v560_v63  ;;  %v1104_v28 = vld [vmem:[%s3046_s29 + $0x16] sm:$0x1] }
  0x31   : > { %v825_v1 = vld [vmem:[%s3046_s29 + $0x24] sm:$0x1]  ;;  %v826_v2 = vld [vmem:[%s3046_s29 + $0x34] sm:$0x1]  ;;  %v839_v3 = vrot.slane %v824_v61, 7  ;;  %v432_v4 = vsel %vm281_vm6, %v431_v38, %v430_v62  ;;  %v564_v9 = vsel %vm269_vm2, %v563_v54, %v562_v5  ;;  %251 = vperm.xlu0 %2826, %v214_v57   ;;  %v1119_v37 = vrot.slane %v1104_v28, 7 }
  0x32   : > { %v827_v6 = vld [vmem:[%s3046_s29 + $0x44] sm:$0x1]  ;;  %v828_v7 = vld [vmem:[%s3046_s29 + $0x54] sm:$0x1]  ;;  %449 = vmatpush.msra.mxu3 %v432_v4  ;;  %v841_v12 = vrot.slane %v825_v1, 6  ;;  %v843_v13 = vrot.slane %v826_v2, 5  ;;  %v566_v14 = vsel %vm272_vm3, %v565_v58, %v564_v9 }
  0x33   : > { %v829_v8 = vld [vmem:[%s3046_s29 + $0x64] sm:$0x1]  ;;  %v830_v10 = vld [vmem:[%s3046_s29 + $0x74] sm:$0x1]  ;;  %v840_v11 = vsel %vm263_vm0, %v839_v3, %v823_v55  ;;  %2630 = vmatmul.msk.f32.vlgmr.msra.gmra.mxu3 %vm284_vm7, %v3075_v33  ;;  %v845_v15 = vrot.slane %v827_v6, 4  ;;  %v847_v16 = vrot.slane %v828_v7, 3  ;;  %v568_v18 = vsel %vm275_vm4, %v567_v59, %v566_v14 }
  0x34   : > { %v3121_v17 = vld [vmem:[%s4014_s1 + $0x8] sm:$0xff]  ;;  %v842_v19 = vsel %vm266_vm1, %v841_v12, %v840_v11  ;;  %v849_v20 = vrot.slane %v829_v8, 2  ;;  %v570_v21 = vsel %vm278_vm5, %v569_v60, %v568_v18  ;;  %v851_v23 = vrot.slane %v830_v10, 1  ;;  %v1106_v31 = vld [vmem:[%s3046_s29 + $0x36] sm:$0x1]  ;;  %s3465_s9 = scalar_lea.vmem [#allocation5], %s2617_s8 }
  0x35   : > { %v844_v22 = vsel %vm269_vm2, %v843_v13, %v842_v19  ;;  %v572_v24 = vsel %vm281_vm6, %v571_v0, %v570_v21  ;;  %v1103_v27 = vld [vmem:[%s3046_s29 + $0x6] sm:$0x1]  ;;  %v1108_v34 = vld [vmem:[%s3046_s29 + $0x56] sm:$0x1]  ;;  %v1123_v40 = vrot.slane %v1106_v31, 5  ;;  %vm368_vm13 = vcmask 253952  }
  0x36   : > { %v846_v25 = vsel %vm272_vm3, %v845_v15, %v844_v22  ;;  %v1105_v29 = vld [vmem:[%s3046_s29 + $0x26] sm:$0x1]  ;;  %589 = vmatpush.msrb.mxu0 %v572_v24  ;;  %v1110_v39 = vld [vmem:[%s3046_s29 + $0x76] sm:$0x1]  ;;  %v1120_v42 = vsel %vm263_vm0, %v1119_v37, %v1103_v27  ;;  %v1127_v43 = vrot.slane %v1108_v34, 3  ;;  %s2945_s10 = smov 32  }
  0x37   : > { %2623 = vmatmul.msk.f32.gmra.mxu0 %vm284_vm7, %v3121_v17  ;;  %v848_v26 = vsel %vm275_vm4, %v847_v16, %v846_v25  ;;  %v1107_v32 = vld [vmem:[%s3046_s29 + $0x46] sm:$0x1]  ;;  %v1121_v38 = vrot.slane %v1105_v29, 6  ;;  %v1131_v47 = vrot.slane %v1110_v39, 1  ;;  %v1383_v52 = vld [vmem:[%s3046_s29 + $0x8] sm:$0x1] }
  0x38   : > { %v850_v30 = vsel %vm278_vm5, %v849_v20, %v848_v26  ;;  %v1109_v36 = vld [vmem:[%s3046_s29 + $0x66] sm:$0x1]  ;;  %v1125_v41 = vrot.slane %v1107_v32, 4  ;;  %v1384_v53 = vld [vmem:[%s3046_s29 + $0x18] sm:$0x1]  ;;  %vm398_vm14 = vcmask 516352  }
  0x39   : > { %v852_v35 = vsel %vm281_vm6, %v851_v23, %v850_v30  ;;  %v1122_v44 = vsel %vm266_vm1, %v1121_v38, %v1120_v42  ;;  %v1129_v45 = vrot.slane %v1109_v36, 2  ;;  %v1385_v54 = vld [vmem:[%s3046_s29 + $0x28] sm:$0x1]  ;;  %v1386_v55 = vld [vmem:[%s3046_s29 + $0x38] sm:$0x1]  ;;  %v1399_v59 = vrot.slane %v1384_v53, 7 }
  0x3a   : > { %869 = vmatpush.msra.mxu0 %v852_v35  ;;  %v1124_v46 = vsel %vm269_vm2, %v1123_v40, %v1122_v44  ;;  %v1387_v56 = vld [vmem:[%s3046_s29 + $0x48] sm:$0x1]  ;;  %v1388_v57 = vld [vmem:[%s3046_s29 + $0x58] sm:$0x1]  ;;  %v1401_v60 = vrot.slane %v1385_v54, 6  ;;  %v1403_v62 = vrot.slane %v1386_v55, 5 }
  0x3b   : > { %2631 = vmatmul.msk.f32.gmra.mxu3 %vm284_vm7, %v3121_v17  ;;  %v1126_v48 = vsel %vm272_vm3, %v1125_v41, %v1124_v46  ;;  %v1389_v58 = vld [vmem:[%s3046_s29 + $0x68] sm:$0x1]  ;;  %v1390_v61 = vld [vmem:[%s3046_s29 + $0x78] sm:$0x1]  ;;  %v1405_v63 = vrot.slane %v1387_v56, 4  ;;  %v1400_v0 = vsel %vm263_vm0, %v1399_v59, %v1383_v52  ;;  %v1407_v1 = vrot.slane %v1388_v57, 3 }
  0x3c   : > { %v1128_v49 = vsel %vm275_vm4, %v1127_v43, %v1126_v48  ;;  %v1402_v2 = vsel %vm266_vm1, %v1401_v60, %v1400_v0  ;;  %v1409_v3 = vrot.slane %v1389_v58, 2  ;;  %v1411_v5 = vrot.slane %v1390_v61, 1  ;;  %v1663_v10 = vld [vmem:[%s3046_s29 + $0xa] sm:$0x1]  ;;  %v1664_v11 = vld [vmem:[%s3046_s29 + $0x1a] sm:$0x1] }
  0x3d   : > { %v1130_v50 = vsel %vm278_vm5, %v1129_v45, %v1128_v49  ;;  %v1404_v4 = vsel %vm269_vm2, %v1403_v62, %v1402_v2  ;;  %v1665_v12 = vld [vmem:[%s3046_s29 + $0x2a] sm:$0x1]  ;;  %v1666_v13 = vld [vmem:[%s3046_s29 + $0x3a] sm:$0x1]  ;;  %v1679_v18 = vrot.slane %v1664_v11, 7  ;;  %s2756_s11 = sshll.u32 %s2931_s15, 6 }
  0x3e   : > { %v1132_v51 = vsel %vm281_vm6, %v1131_v47, %v1130_v50  ;;  %v1406_v6 = vsel %vm272_vm3, %v1405_v63, %v1404_v4  ;;  %v1667_v14 = vld [vmem:[%s3046_s29 + $0x4a] sm:$0x1]  ;;  %v1668_v15 = vld [vmem:[%s3046_s29 + $0x5a] sm:$0x1]  ;;  %v1681_v19 = vrot.slane %v1665_v12, 6  ;;  %v1683_v21 = vrot.slane %v1666_v13, 5  ;;  %s2517_s23 = scalar_lea.hbm %s4016_s3, %s2756_s11 }
  0x3f   : > { %2638 = vmatmul.msk.f32.vlgmr.msrb.gmra.mxu0 %vm284_vm7, %v3075_v33  ;;  %v1408_v7 = vsel %vm275_vm4, %v1407_v1, %v1406_v6  ;;  %v1669_v16 = vld [vmem:[%s3046_s29 + $0x6a] sm:$0x1]  ;;  %v1670_v20 = vld [vmem:[%s3046_s29 + $0x7a] sm:$0x1]  ;;  %v1685_v22 = vrot.slane %v1667_v14, 4  ;;  %v1680_v23 = vsel %vm263_vm0, %v1679_v18, %v1663_v10  ;;  %v1687_v24 = vrot.slane %v1668_v15, 3 }
  0x40   : > { %1149 = vmatpush.msrb.mxu0 %v1132_v51  ;;  %v1410_v8 = vsel %vm278_vm5, %v1409_v3, %v1408_v7  ;;  %v1682_v25 = vsel %vm266_vm1, %v1681_v19, %v1680_v23  ;;  %v1689_v26 = vrot.slane %v1669_v16, 2  ;;  %v1691_v28 = vrot.slane %v1670_v20, 1  ;;  %v1943_v34 = vld [vmem:[%s3046_s29 + $0xc] sm:$0x1]  ;;  %v1944_v35 = vld [vmem:[%s3046_s29 + $0x1c] sm:$0x1] }
  0x41   : > { %v1412_v9 = vsel %vm281_vm6, %v1411_v5, %v1410_v8  ;;  %v1684_v27 = vsel %vm269_vm2, %v1683_v21, %v1682_v25  ;;  %v1945_v36 = vld [vmem:[%s3046_s29 + $0x2c] sm:$0x1]  ;;  %v1946_v37 = vld [vmem:[%s3046_s29 + $0x3c] sm:$0x1]  ;;  %v1959_v41 = vrot.slane %v1944_v35, 7  ;;  %v215_v14 = vlaneseq  ;;  %s2520_s22 = sshll.u32 %s2517_s23, 4  ;;  %s2521_s22 = int_to_ptr.hbm [resolvable:$true] %s2520_s22 }
  0x42   : > { %v1686_v29 = vsel %vm272_vm3, %v1685_v22, %v1684_v27  ;;  %v1947_v38 = vld [vmem:[%s3046_s29 + $0x4c] sm:$0x1]  ;;  %v1948_v39 = vld [vmem:[%s3046_s29 + $0x5c] sm:$0x1]  ;;  %v1961_v42 = vrot.slane %v1945_v36, 6  ;;  %v1963_v44 = vrot.slane %v1946_v37, 5 }
  0x43   : > { %v1688_v30 = vsel %vm275_vm4, %v1687_v24, %v1686_v29  ;;  %v1949_v40 = vld [vmem:[%s3046_s29 + $0x6c] sm:$0x1]  ;;  %v1950_v43 = vld [vmem:[%s3046_s29 + $0x7c] sm:$0x1]  ;;  %v1965_v45 = vrot.slane %v1947_v38, 4  ;;  %v1960_v46 = vsel %vm263_vm0, %v1959_v41, %v1943_v34  ;;  %v1967_v47 = vrot.slane %v1948_v39, 3 }
  0x44   : > { %v1690_v31 = vsel %vm278_vm5, %v1689_v26, %v1688_v30  ;;  %v1962_v48 = vsel %vm266_vm1, %v1961_v42, %v1960_v46  ;;  %v1969_v49 = vrot.slane %v1949_v40, 2  ;;  %v1971_v51 = vrot.slane %v1950_v43, 1  ;;  %v2223_v56 = vld [vmem:[%s3046_s29 + $0xe] sm:$0x1]  ;;  %v2224_v57 = vld [vmem:[%s3046_s29 + $0x1e] sm:$0x1] }
  0x45   : > { %v1692_v32 = vsel %vm281_vm6, %v1691_v28, %v1690_v31  ;;  %v1964_v50 = vsel %vm269_vm2, %v1963_v44, %v1962_v48  ;;  %v2225_v58 = vld [vmem:[%s3046_s29 + $0x2e] sm:$0x1]  ;;  %v2226_v59 = vld [vmem:[%s3046_s29 + $0x3e] sm:$0x1]  ;;  %v2239_v63 = vrot.slane %v2224_v57, 7  ;;  %v216_v15 = vshrl.u32 %v215_v14, 7 }
  0x46   : > { %v1966_v52 = vsel %vm272_vm3, %v1965_v45, %v1964_v50  ;;  %v2227_v60 = vld [vmem:[%s3046_s29 + $0x4e] sm:$0x1]  ;;  %v2228_v61 = vld [vmem:[%s3046_s29 + $0x5e] sm:$0x1]  ;;  %v2241_v0 = vrot.slane %v2225_v58, 6  ;;  %v2243_v2 = vrot.slane %v2226_v59, 5 }
  0x47   : > { %2639 = vmatmul.msk.f32.gmra.mxu0 %vm284_vm7, %v3121_v17  ;;  %v1968_v53 = vsel %vm275_vm4, %v1967_v47, %v1966_v52  ;;  %v2229_v62 = vld [vmem:[%s3046_s29 + $0x6e] sm:$0x1]  ;;  %v2230_v1 = vld [vmem:[%s3046_s29 + $0x7e] sm:$0x1]  ;;  %v2245_v3 = vrot.slane %v2227_v60, 4  ;;  %v2240_v4 = vsel %vm263_vm0, %v2239_v63, %v2223_v56  ;;  %v2247_v5 = vrot.slane %v2228_v61, 3 }
  0x48   : > { %v1970_v54 = vsel %vm278_vm5, %v1969_v49, %v1968_v53  ;;  %v2242_v6 = vsel %vm266_vm1, %v2241_v0, %v2240_v4  ;;  %v2249_v7 = vrot.slane %v2229_v62, 2  ;;  %v217_v16 = vadd.s32 8, %v216_v15  ;;  %v684_v27 = vld [vmem:[%s3046_s29 + $0x13] sm:$0x1]  ;;  %v685_v29 = vld [vmem:[%s3046_s29 + $0x23] sm:$0x1] }
  0x49   : > { %v1972_v55 = vsel %vm281_vm6, %v1971_v51, %v1970_v54  ;;  %v2244_v8 = vsel %vm269_vm2, %v2243_v2, %v2242_v6  ;;  %v219_v18 = vand.u32 127, %v215_v14  ;;  %v220_v20 = vmul.u32 2, %v216_v15  ;;  %v683_v30 = vld [vmem:[%s3046_s29 + $0x3] sm:$0x1]  ;;  %v686_v31 = vld [vmem:[%s3046_s29 + $0x33] sm:$0x1] }
  0x4a   : > { %v2246_v10 = vsel %vm272_vm3, %v2245_v3, %v2244_v8  ;;  %v221_v19 = vmul.u32 2, %v217_v16  ;;  %v2944_v23 = vmov 1.0   ;;  %v701_v34 = vrot.slane %v685_v29, 6  ;;  %v687_v35 = vld [vmem:[%s3046_s29 + $0x43] sm:$0x1]  ;;  %s2504_s15 = scalar_lea.sflag [#allocation4], %s3042_s19 }
  0x4b   : > { %v2248_v11 = vsel %vm275_vm4, %v2247_v5, %v2246_v10  ;;  %vm3237_vm9 = vcmp.eq.s32.totalorder %v219_v18, %v220_v20  ;;  %v228_v26 = vadd.s32 1, %v220_v20  ;;  %v703_v37 = vrot.slane %v686_v31, 5  ;;  %v688_v39 = vld [vmem:[%s3046_s29 + $0x53] sm:$0x1]  ;;  %v964_v42 = vld [vmem:[%s3046_s29 + $0x15] sm:$0x1] }
  0x4c   : > { %v2250_v12 = vsel %vm278_vm5, %v2249_v7, %v2248_v11  ;;  %vm3233_vm8 = vcmp.eq.s32.totalorder %v219_v18, %v221_v19  ;;  %v229_v24 = vadd.s32 1, %v221_v19  ;;  %v705_v40 = vrot.slane %v687_v35, 4  ;;  %v965_v43 = vld [vmem:[%s3046_s29 + $0x25] sm:$0x1]  ;;  %v689_v45 = vld [vmem:[%s3046_s29 + $0x63] sm:$0x1] }
  0x4d   : > { %2627 = vmatpush.msk.msra.mxu2 %vm3233_vm8, %v2944_v23  ;;  %vm3266_vm11 = vcmp.eq.s32.totalorder %v219_v18, %v228_v26  ;;  %v963_v44 = vld [vmem:[%s3046_s29 + $0x5] sm:$0x1]  ;;  %v707_v46 = vrot.slane %v688_v39, 3  ;;  %v979_v47 = vrot.slane %v964_v42, 7  ;;  %v966_v49 = vld [vmem:[%s3046_s29 + $0x35] sm:$0x1] }
  0x4e   : > { %vm3255_vm10 = vcmp.eq.s32.totalorder %v219_v18, %v229_v24  ;;  %v981_v50 = vrot.slane %v965_v43, 6  ;;  %v690_v52 = vld [vmem:[%s3046_s29 + $0x73] sm:$0x1]  ;;  %v709_v53 = vrot.slane %v689_v45, 2  ;;  %v983_v56 = vrot.slane %v966_v49, 5  ;;  %s2871_s24 = sshra.s32 %s2521_s22, 4  ;;  %s2872_s24 = int_to_ptr.hbm [resolvable:$true] %s2871_s24 }
  0x4f   : > { %2654 = vmatmul.msk.f32.vlgmr.msra.gmra.mxu0 %vm284_vm7, %v3075_v33  ;;  %2628 = vmatpush.msk.msra.mxu2 %vm3237_vm9, %v2944_v23  ;;  %v980_v51 = vsel %vm263_vm0, %v979_v47, %v963_v44  ;;  %v711_v58 = vrot.slane %v690_v52, 1  ;;  %v968_v61 = vld [vmem:[%s3046_s29 + $0x55] sm:$0x1]  ;;  %v969_v3 = vld [vmem:[%s3046_s29 + $0x65] sm:$0x1]  ;;  %s2873_s28 = scalar_lea.hbm %s2872_s24, 64  ;;  %p2878_p7 = scmp.lt.s32.totalorder %s2872_s24, %s4016_s3 }
  0x50   : > { %1429 = vmatpush.msra.mxu0 %v1412_v9  ;;  %v2251_v9 = vrot.slane %v2230_v1, 1  ;;  %2624 = vmatpush.msk.msra.mxu1 %vm3255_vm10, %v2944_v23  ;;  %v982_v57 = vsel %vm266_vm1, %v981_v50, %v980_v51  ;;  %v987_v4 = vrot.slane %v968_v61, 3  ;;  %v970_v6 = vld [vmem:[%s3046_s29 + $0x75] sm:$0x1]  ;;  %v989_v7 = vrot.slane %v969_v3, 2  ;;  %p2874_p4 = scmp.ne.s32.totalorder %s2872_s24, %s2873_s28  ;;  %s2877_s5 = scalar_lea.hbm %s4016_s3, 128 }
  0x51   : > { %2635 = vmatpush.msk.msrb.mxu2 %vm3233_vm8, %v2944_v23  ;;  %2640 = vmatpush.msk.msrb.mxu3 %vm3255_vm10, %v2944_v23  ;;  %v984_v63 = vsel %vm269_vm2, %v983_v56, %v982_v57  ;;  %v1244_v18 = vld [vmem:[%s3046_s29 + $0x17] sm:$0x1]  ;;  %v1245_v19 = vld [vmem:[%s3046_s29 + $0x27] sm:$0x1]  ;;  %v1524_v52 = vld [vmem:[%s3046_s29 + $0x19] sm:$0x1]  ;;  %p2879_p8 = scmp.lt.s32.totalorder %s2877_s5, %s2873_s28 }
  0x52   : > { %v2252_v13 = vsel %vm281_vm6, %v2251_v9, %v2250_v12  ;;  %2625 = vmatpush.msk.msra.mxu1 %vm3266_vm11, %v2944_v23  ;;  %v991_v9 = vrot.slane %v970_v6, 1  ;;  %v1246_v20 = vld [vmem:[%s3046_s29 + $0x37] sm:$0x1]  ;;  %v1243_v24 = vld [vmem:[%s3046_s29 + $0x7] sm:$0x1]  ;;  %v1261_v31 = vrot.slane %v1245_v19, 6  ;;  %p2875_p5 = pnand %p2874_p4, %p3019_p9 }
  0x53   : > { %2636 = vmatpush.msk.msrb.mxu2 %vm3237_vm9, %v2944_v23  ;;  %2641 = vmatpush.msk.msrb.mxu3 %vm3266_vm11, %v2944_v23  ;;  %v1247_v26 = vld [vmem:[%s3046_s29 + $0x47] sm:$0x1]  ;;  %v1250_v35 = vld [vmem:[%s3046_s29 + $0x77] sm:$0x1]  ;;  %v1526_v56 = vld [vmem:[%s3046_s29 + $0x39] sm:$0x1]  ;;  %p2880_p10 = por %p2879_p8, %p2878_p7 }
  0x54   : > { %2632 = vmatpush.msk.msrb.mxu1 %vm3255_vm10, %v2944_v23  ;;  %v1249_v29 = vld [vmem:[%s3046_s29 + $0x67] sm:$0x1]  ;;  %v1271_v44 = vrot.slane %v1250_v35, 1  ;;  %v1543_v61 = vrot.slane %v1526_v56, 5  ;;  %v1807_v19 = vld [vmem:[%s3046_s29 + $0x4b] sm:$0x1]  ;;  %p2876_p6 = pneg %p2875_p5 }
  0x55   : > { %2648 = vmatpush.msk.msra.mxu3 %vm3255_vm10, %v2944_v23 }
  0x56   : > { %2633 = vmatpush.msk.msrb.mxu1 %vm3266_vm11, %v2944_v23  ;;  %p2881_p13 = pnand %p2880_p10, %p2876_p6 }
  0x57   : > { %2655 = vmatmul.msk.f32.gmra.mxu0 %vm284_vm7, %v3121_v17  ;;  %2649 = vmatpush.msk.msra.mxu3 %vm3266_vm11, %v2944_v23 }
  0x5f   : > { %2670 = vmatmul.msk.f32.vlgmr.msrb.gmra.mxu0 %vm284_vm7, %v3075_v33 }
  0x60   : > { %1709 = vmatpush.msrb.mxu0 %v1692_v32  ;;  %v699_v32 = vrot.slane %v684_v27, 7  ;;  %v1248_v27 = vld [vmem:[%s3046_s29 + $0x57] sm:$0x1] }
  0x62   : > { %v700_v36 = vsel %vm263_vm0, %v699_v32, %v683_v30  ;;  %v1259_v30 = vrot.slane %v1244_v18, 7  ;;  %v1263_v32 = vrot.slane %v1246_v20, 5 }
  0x63   : > { %v702_v38 = vsel %vm266_vm1, %v701_v34, %v700_v36  ;;  %v1265_v36 = vrot.slane %v1247_v26, 4  ;;  %v1808_v26 = vld [vmem:[%s3046_s29 + $0x5b] sm:$0x1] }
  0x64   : > { %v704_v41 = vsel %vm269_vm2, %v703_v37, %v702_v38  ;;  %v1260_v37 = vsel %vm263_vm0, %v1259_v30, %v1243_v24  ;;  %v1267_v38 = vrot.slane %v1248_v27, 3  ;;  %v1809_v30 = vld [vmem:[%s3046_s29 + $0x6b] sm:$0x1] }
  0x65   : > { %v706_v48 = vsel %vm272_vm3, %v705_v40, %v704_v41  ;;  %v1262_v40 = vsel %vm266_vm1, %v1261_v31, %v1260_v37  ;;  %v1269_v41 = vrot.slane %v1249_v29, 2  ;;  %v1825_v29 = vrot.slane %v1807_v19, 4  ;;  %v1810_v31 = vld [vmem:[%s3046_s29 + $0x7b] sm:$0x1] }
  0x66   : > { %v708_v54 = vsel %vm275_vm4, %v707_v46, %v706_v48  ;;  %v1264_v43 = vsel %vm269_vm2, %v1263_v32, %v1262_v40  ;;  %v1831_v37 = vrot.slane %v1810_v31, 1 }
  0x67   : > { %2671 = vmatmul.msk.f32.gmra.mxu0 %vm284_vm7, %v3121_v17  ;;  %v710_v60 = vsel %vm278_vm5, %v709_v53, %v708_v54  ;;  %v1266_v45 = vsel %vm272_vm3, %v1265_v36, %v1264_v43  ;;  %v1525_v53 = vld [vmem:[%s3046_s29 + $0x29] sm:$0x1]  ;;  %v1539_v54 = vrot.slane %v1524_v52, 7  ;;  %v1829_v36 = vrot.slane %v1809_v30, 2 }
  0x68   : > { %v712_v2 = vsel %vm281_vm6, %v711_v58, %v710_v60  ;;  %v1268_v46 = vsel %vm275_vm4, %v1267_v38, %v1266_v45  ;;  %v1541_v57 = vrot.slane %v1525_v53, 6  ;;  %v1527_v58 = vld [vmem:[%s3046_s29 + $0x49] sm:$0x1]  ;;  %v2086_v45 = vld [vmem:[%s3046_s29 + $0x3d] sm:$0x1] }
  0x69   : > { %v1270_v47 = vsel %vm278_vm5, %v1269_v41, %v1268_v46  ;;  %v2084_v41 = vld [vmem:[%s3046_s29 + $0x1d] sm:$0x1]  ;;  %v2089_v53 = vld [vmem:[%s3046_s29 + $0x6d] sm:$0x1] }
  0x6a   : > { %v1272_v48 = vsel %vm281_vm6, %v1271_v44, %v1270_v47  ;;  %v2099_v43 = vrot.slane %v2084_v41, 7  ;;  %v2083_v44 = vld [vmem:[%s3046_s29 + $0xd] sm:$0x1] }
  0x6b   : > { %v2087_v47 = vld [vmem:[%s3046_s29 + $0x4d] sm:$0x1] }
  0x6c   : > { %v2105_v52 = vrot.slane %v2087_v47, 4 }
  0x6f   : > { %2686 = vmatmul.msk.f32.vlgmr.msra.gmra.mxu0 %vm284_vm7, %v3075_v33 }
  0x70   : > { %1989 = vmatpush.msra.mxu0 %v1972_v55  ;;  %v967_v55 = vld [vmem:[%s3046_s29 + $0x45] sm:$0x1] }
  0x71   : > { %v985_v62 = vrot.slane %v967_v55, 4  ;;  %v1523_v55 = vld [vmem:[%s3046_s29 + $0x9] sm:$0x1] }
  0x72   : > { %v1540_v60 = vsel %vm263_vm0, %v1539_v54, %v1523_v55  ;;  %v2090_v54 = vld [vmem:[%s3046_s29 + $0x7d] sm:$0x1] }
  0x73   : > { %v986_v5 = vsel %vm272_vm3, %v985_v62, %v984_v63  ;;  %v1528_v62 = vld [vmem:[%s3046_s29 + $0x59] sm:$0x1]  ;;  %v1542_v63 = vsel %vm266_vm1, %v1541_v57, %v1540_v60  ;;  %v2111_v60 = vrot.slane %v2090_v54, 1 }
  0x74   : > { %v988_v8 = vsel %vm275_vm4, %v987_v4, %v986_v5  ;;  %v1544_v3 = vsel %vm269_vm2, %v1543_v61, %v1542_v63  ;;  %v1547_v4 = vrot.slane %v1528_v62, 3 }
  0x75   : > { %v990_v12 = vsel %vm278_vm5, %v989_v7, %v988_v8 }
  0x76   : > { %v992_v16 = vsel %vm281_vm6, %v991_v9, %v990_v12  ;;  %v1804_v12 = vld [vmem:[%s3046_s29 + $0x1b] sm:$0x1] }
  0x77   : > { %2687 = vmatmul.msk.f32.gmra.mxu0 %vm284_vm7, %v3121_v17 }
  0x7f   : > { %2702 = vmatmul.msk.f32.vlgmr.msrb.gmra.mxu0 %vm284_vm7, %v3075_v33 }
  0x80   : > { %2269 = vmatpush.msrb.mxu0 %v2252_v13 }
  0x87   : > { %2703 = vmatmul.msk.f32.gmra.mxu0 %vm284_vm7, %v3121_v17 }
  0x8f   : > { %2718 = vmatmul.msk.f32.vlgmr.msra.gmra.mxu0 %vm284_vm7, %v3075_v33 }
  0x97   : > { %2719 = vmatmul.msk.f32.gmra.mxu0 %vm284_vm7, %v3121_v17 }
  0x9a   : > { %v3311_v59 = vpop.permute.xlu0 %246 }
  0x9f   : > { %2734 = vmatmul.msk.f32.vlgmr.msrb.gmra.mxu0 %vm284_vm7, %v3075_v33 }
  0xa3   : > { %v3323_v10 = vpop.permute.xlu0 %251 }
  0xa7   : > { %2735 = vmatmul.msk.f32.gmra.mxu0 %vm284_vm7, %v3121_v17 }
  0xac   : > { %v308_v0 = vpop.f32.mrf.mxu0 }
  0xad   : > { %v309_v1 = vadd.f32 %v308_v0, %v3311_v59  ;;  %v1545_v0 = vrot.slane %v1527_v58, 4  ;;  %v2109_v58 = vrot.slane %v2089_v53, 2 }
  0xaf   : > { %2629 = vmatmul.msk.f32.vlgmr.msra.gmra.mxu2 %vm314_vm12, %v309_v1  ;;  %v1529_v1 = vld [vmem:[%s3046_s29 + $0x69] sm:$0x1]  ;;  %v1546_v5 = vsel %vm272_vm3, %v1545_v0, %v1544_v3  ;;  %v2364_v0 = vld [vmem:[%s3046_s29 + $0x1f] sm:$0x1]  ;;  %v2363_v3 = vld [vmem:[%s3046_s29 + $0xf] sm:$0x1] }
  0xb0   : > { %729 = vmatpush.msra.mxu2 %v712_v2  ;;  %v1530_v2 = vld [vmem:[%s3046_s29 + $0x79] sm:$0x1]  ;;  %v1549_v6 = vrot.slane %v1529_v1, 2  ;;  %v1548_v8 = vsel %vm275_vm4, %v1547_v4, %v1546_v5  ;;  %v2365_v1 = vld [vmem:[%s3046_s29 + $0x2f] sm:$0x1] }
  0xb1   : > { %v1551_v7 = vrot.slane %v1530_v2, 1  ;;  %v2379_v2 = vrot.slane %v2364_v0, 7  ;;  %v2366_v4 = vld [vmem:[%s3046_s29 + $0x3f] sm:$0x1]  ;;  %v2381_v5 = vrot.slane %v2365_v1, 6 }
  0xb2   : > { %v1550_v9 = vsel %vm278_vm5, %v1549_v6, %v1548_v8  ;;  %v2367_v6 = vld [vmem:[%s3046_s29 + $0x4f] sm:$0x1]  ;;  %v2383_v8 = vrot.slane %v2366_v4, 5 }
  0xb4   : > { %v311_v11 = vpop.f32.mrf.mxu0 }
  0xb5   : > { %v312_v13 = vadd.f32 %v311_v11, %v3323_v10  ;;  %v1552_v11 = vsel %vm281_vm6, %v1551_v7, %v1550_v9  ;;  %v2380_v7 = vsel %vm263_vm0, %v2379_v2, %v2363_v3  ;;  %v2368_v9 = vld [vmem:[%s3046_s29 + $0x5f] sm:$0x1] }
  0xb6   : > { %v451_v14 = vpop.f32.mrf.mxu3 }
  0xb7   : > { %v452_v15 = vadd.f32 %v451_v14, %v3311_v59  ;;  %2626 = vmatmul.msk.f32.vlgmr.msra.gmra.mxu1 %vm314_vm12, %v312_v13  ;;  %v1805_v13 = vld [vmem:[%s3046_s29 + $0x2b] sm:$0x1]  ;;  %v1819_v14 = vrot.slane %v1804_v12, 7  ;;  %v2385_v12 = vrot.slane %v2367_v6, 4 }
  0xb8   : > { %2643 = vmatpush.msk.msra.mxu1 %vm3233_vm8, %v2944_v23  ;;  %v1821_v18 = vrot.slane %v1805_v13, 6  ;;  %v2369_v13 = vld [vmem:[%s3046_s29 + $0x6f] sm:$0x1] }
  0xb9   : > { %2637 = vmatmul.msk.f32.vlgmr.msrb.gmra.mxu2 %vm314_vm12, %v452_v15  ;;  %v1803_v15 = vld [vmem:[%s3046_s29 + $0xb] sm:$0x1]  ;;  %v2389_v19 = vrot.slane %v2369_v13, 2 }
  0xba   : > { %1009 = vmatpush.msrb.mxu2 %v992_v16  ;;  %2644 = vmatpush.msk.msra.mxu1 %vm3237_vm9, %v2944_v23  ;;  %v1806_v16 = vld [vmem:[%s3046_s29 + $0x3b] sm:$0x1]  ;;  %v1820_v20 = vsel %vm263_vm0, %v1819_v14, %v1803_v15  ;;  %v2370_v14 = vld [vmem:[%s3046_s29 + $0x7f] sm:$0x1] }
  0xbb   : > { %v1823_v24 = vrot.slane %v1806_v16, 5  ;;  %v1822_v27 = vsel %vm266_vm1, %v1821_v18, %v1820_v20  ;;  %v2387_v16 = vrot.slane %v2368_v9, 3  ;;  %v2391_v20 = vrot.slane %v2370_v14, 1 }
  0xbc   : > { %v591_v34 = vpop.f32.mrf.mxu0 }
  0xbd   : > { %v592_v51 = vadd.f32 %v591_v34, %v3311_v59  ;;  %v1824_v32 = vsel %vm269_vm2, %v1823_v24, %v1822_v27  ;;  %v1827_v34 = vrot.slane %v1808_v26, 3 }
  0xbe   : > { %v454_v39 = vpop.f32.mrf.mxu3  ;;  %v1826_v35 = vsel %vm272_vm3, %v1825_v29, %v1824_v32 }
  0xbf   : > { %v455_v42 = vadd.f32 %v454_v39, %v3323_v10  ;;  %v1828_v38 = vsel %vm275_vm4, %v1827_v34, %v1826_v35 }
  0xc0   : > { %v1830_v39 = vsel %vm278_vm5, %v1829_v36, %v1828_v38 }
  0xc1   : > { %2634 = vmatmul.msk.f32.vlgmr.msrb.gmra.mxu1 %vm314_vm12, %v455_v42  ;;  %2646 = vmatmul.msk.f32.vlgmr.msra.gmra.mxu2 %vm284_vm7, %v3075_v33  ;;  %v1832_v40 = vsel %vm281_vm6, %v1831_v37, %v1830_v39  ;;  %v2085_v42 = vld [vmem:[%s3046_s29 + $0x2d] sm:$0x1] }
  0xc2   : > { %2651 = vmatpush.msk.msrb.mxu1 %vm3233_vm8, %v2944_v23  ;;  %1289 = vmatpush.msra.mxu2 %v1272_v48  ;;  %v2101_v46 = vrot.slane %v2085_v42, 6  ;;  %v2100_v48 = vsel %vm263_vm0, %v2099_v43, %v2083_v44 }
  0xc4   : > { %v594_v49 = vpop.f32.mrf.mxu0  ;;  %2652 = vmatpush.msk.msrb.mxu1 %vm3237_vm9, %v2944_v23 }
  0xc5   : > { %v595_v50 = vadd.f32 %v594_v49, %v3323_v10  ;;  %v2103_v49 = vrot.slane %v2086_v45, 5 }
  0xc7   : > { %2642 = vmatmul.msk.f32.vlgmr.msrb.gmra.mxu3 %vm314_vm12, %v595_v50  ;;  %v2088_v50 = vld [vmem:[%s3046_s29 + $0x5d] sm:$0x1]  ;;  %s2518_s29 = sshll.u32 %s3465_s9, 4  ;;  %s2519_s29 = int_to_ptr.vmem [resolvable:$true] %s2518_s29 }
  0xc8   : > { %2656 = vmatpush.msk.msrb.mxu3 %vm3255_vm10, %v2944_v23  ;;  %v2107_v56 = vrot.slane %v2088_v50, 3 }
  0xc9   : > { %2645 = vmatmul.msk.f32.vlgmr.msra.gmra.mxu1 %vm314_vm12, %v592_v51  ;;  %2647 = vmatmul.msk.f32.gmra.mxu2 %vm284_vm7, %v3121_v17  ;;  %v2102_v51 = vsel %vm266_vm1, %v2101_v46, %v2100_v48 }
  0xca   : > { %2659 = vmatpush.msk.msra.mxu1 %vm3233_vm8, %v2944_v23  ;;  %2657 = vmatpush.msk.msrb.mxu3 %vm3266_vm11, %v2944_v23  ;;  %v2104_v55 = vsel %vm269_vm2, %v2103_v49, %v2102_v51 }
  0xcb   : > { %v2106_v57 = vsel %vm272_vm3, %v2105_v52, %v2104_v55 }
  0xcc   : > { %2660 = vmatpush.msk.msra.mxu1 %vm3237_vm9, %v2944_v23  ;;  %v2108_v61 = vsel %vm275_vm4, %v2107_v56, %v2106_v57  ;;  %v871_v30 = vpop.f32.mrf.mxu0 }
  0xcd   : > { %v2110_v62 = vsel %vm278_vm5, %v2109_v58, %v2108_v61  ;;  %v872_v58 = vadd.f32 %v871_v30, %v3311_v59 }
  0xce   : > { %v2112_v63 = vsel %vm281_vm6, %v2111_v60, %v2110_v62 }
  0xd1   : > { %2662 = vmatmul.msk.f32.vlgmr.msrb.gmra.mxu2 %vm284_vm7, %v3075_v33 }
  0xd2   : > { %1569 = vmatpush.msrb.mxu2 %v1552_v11  ;;  %v2382_v11 = vsel %vm266_vm1, %v2381_v5, %v2380_v7 }
  0xd3   : > { %v2384_v15 = vsel %vm269_vm2, %v2383_v8, %v2382_v11 }
  0xd4   : > { %v2386_v18 = vsel %vm272_vm3, %v2385_v12, %v2384_v15 }
  0xd5   : > { %v2388_v24 = vsel %vm275_vm4, %v2387_v16, %v2386_v18 }
  0xd6   : > { %v2390_v26 = vsel %vm278_vm5, %v2389_v19, %v2388_v24 }
  0xd7   : > { %v2392_v27 = vsel %vm281_vm6, %v2391_v20, %v2390_v26 }
  0xd9   : > { %2663 = vmatmul.msk.f32.gmra.mxu2 %vm284_vm7, %v3121_v17 }
  0xe1   : > { %2678 = vmatmul.msk.f32.vlgmr.msra.gmra.mxu2 %vm284_vm7, %v3075_v33 }
  0xe2   : > { %1849 = vmatpush.msra.mxu2 %v1832_v40 }
  0xe9   : > { %2679 = vmatmul.msk.f32.gmra.mxu2 %vm284_vm7, %v3121_v17 }
  0xf1   : > { %2694 = vmatmul.msk.f32.vlgmr.msrb.gmra.mxu2 %vm284_vm7, %v3075_v33 }
  0xf2   : > { %2129 = vmatpush.msrb.mxu2 %v2112_v63 }
  0xf9   : > { %2695 = vmatmul.msk.f32.gmra.mxu2 %vm284_vm7, %v3121_v17 }
 0x101   : > { %2710 = vmatmul.msk.f32.vlgmr.msra.gmra.mxu2 %vm284_vm7, %v3075_v33 }
 0x102   : > { %2409 = vmatpush.msra.mxu2 %v2392_v27 }
 0x109   : > { %2711 = vmatmul.msk.f32.gmra.mxu2 %vm284_vm7, %v3121_v17 }
 0x111   : > { %2726 = vmatmul.msk.f32.vlgmr.msrb.gmra.mxu2 %vm284_vm7, %v3075_v33 }
 0x119   : > { %2727 = vmatmul.msk.f32.gmra.mxu2 %vm284_vm7, %v3121_v17 }
 0x121   : > { %2742 = vmatmul.msk.f32.vlgmr.msra.gmra.mxu2 %vm284_vm7, %v3075_v33 }
 0x129   : > { %2743 = vmatmul.msk.f32.gmra.mxu2 %vm284_vm7, %v3121_v17  ;;  %v3475_v17 = vpop.f32.mrf.mxu0 }
 0x12a   : > { %v875_v12 = vadd.f32 %v3475_v17, %v3323_v10 }
 0x131   : > { %v1151_v52 = vpop.f32.mrf.mxu0 }
 0x132   : > { %v358_v29 = vpop.f32.mrf.mxu2  ;;  %v1152_v26 = vadd.f32 %v1151_v52, %v3311_v59 }
 0x134   : > { %v335_v31 = vpop.f32.mrf.mxu1 }
 0x135   : > { %v359_v32 = vadd.f32 %v358_v29, %v335_v31 }
 0x137   : > { %v362_v34 = vrot.slane %v359_v32, 1  ;;  %v363_v35 = vrot.slane %v359_v32, 2  ;;  %v364_v36 = vrot.slane %v359_v32, 3  ;;  %373 = vst [vmem:[#allocation1] sm:$0xff] %v359_v32 }
 0x138   : > { %369 = vst.msk [vmem:[%s3465_s9] sm:$0x1] %vm368_vm13, %v359_v32 }
 0x139   : > { %371 = vst.msk [vmem:[%s3465_s9 + $0x20] sm:$0x1] %vm368_vm13, %v363_v35  ;;  %v1154_v7 = vpop.f32.mrf.mxu0 }
 0x13a   : > { %370 = vst.msk [vmem:[%s3465_s9 + $0x10] sm:$0x1] %vm368_vm13, %v362_v34  ;;  %v1155_v31 = vadd.f32 %v1154_v7, %v3323_v10 }
 0x13b   : > { %372 = vst.msk [vmem:[%s3465_s9 + $0x30] sm:$0x1] %vm368_vm13, %v364_v36 }
 0x13c   : > { %v500_v33 = vpop.f32.mrf.mxu2 }
 0x13e   : > { %v375_v37 = vld [vmem:[#allocation1 + $0x4] ss:$9 sm:$0xff]  ;;  %v379_v39 = vld [vmem:[#allocation1 + $0x6] ss:$9 sm:$0xff]  ;;  %v477_v40 = vpop.f32.mrf.mxu1 }
 0x13f   : > { %v377_v38 = vld [vmem:[#allocation1 + $0x5] ss:$9 sm:$0xff]  ;;  %v381_v41 = vld [vmem:[#allocation1 + $0x7] ss:$9 sm:$0xff]  ;;  %v501_v42 = vadd.f32 %v500_v33, %v477_v40  ;;  %v384_v43 = vperm.slane %v379_v39, 0  ;;  %v382_v44 = vperm.slane %v375_v37, 0 }
 0x140   : > { %v385_v50 = vperm.slane %v381_v41, 0  ;;  %v383_v51 = vperm.slane %v377_v38, 0 }
 0x141   : > { %v504_v45 = vrot.slane %v501_v42, 1  ;;  %v505_v46 = vrot.slane %v501_v42, 2  ;;  %v506_v47 = vrot.slane %v501_v42, 3  ;;  %514 = vst [vmem:[#allocation1] sm:$0xff] %v501_v42  ;;  %390 = vrot.lane.b32.xlu2 %v384_v43, %s2945_s10  ;;  %386 = vrot.lane.b32.xlu1 %v382_v44, %s2945_s10  ;;  %v1431_v19 = vpop.f32.mrf.mxu0 }
 0x142   : > { %510 = vst.msk [vmem:[%s3465_s9 + $0x1] sm:$0x1] %vm368_vm13, %v501_v42  ;;  %v1432_v36 = vadd.f32 %v1431_v19, %v3311_v59 }
 0x143   : > { %511 = vst.msk [vmem:[%s3465_s9 + $0x11] sm:$0x1] %vm368_vm13, %v504_v45 }
 0x144   : > { %v731_v48 = vpop.f32.mrf.mxu2  ;;  %512 = vst.msk [vmem:[%s3465_s9 + $0x21] sm:$0x1] %vm368_vm13, %v505_v46 }
 0x145   : > { %v732_v49 = vadd.f32 %v731_v48, %v3311_v59  ;;  %513 = vst.msk [vmem:[%s3465_s9 + $0x31] sm:$0x1] %vm368_vm13, %v506_v47 }
 0x146   : > { %v640_v55 = vpop.f32.mrf.mxu1 }
 0x147   : > { %2653 = vmatmul.msk.f32.vlgmr.msrb.gmra.mxu1 %vm314_vm12, %v732_v49 }
 0x148   : > { %v516_v53 = vld [vmem:[#allocation1 + $0x4] ss:$9 sm:$0xff]  ;;  %2667 = vmatpush.msk.msrb.mxu1 %vm3233_vm8, %v2944_v23  ;;  %v520_v61 = vld [vmem:[#allocation1 + $0x6] ss:$9 sm:$0xff] }
 0x149   : > { %392 = vrot.lane.b32.xlu2 %v385_v50, %s2945_s10  ;;  %v523_v54 = vperm.slane %v516_v53, 0  ;;  %388 = vrot.lane.b32.xlu1 %v383_v51, %s2945_s10  ;;  %v518_v60 = vld [vmem:[#allocation1 + $0x5] ss:$9 sm:$0xff]  ;;  %v522_v62 = vld [vmem:[#allocation1 + $0x7] ss:$9 sm:$0xff]  ;;  %v525_v4 = vperm.slane %v520_v61, 0  ;;  %v1434_v34 = vpop.f32.mrf.mxu0 }
 0x14a   : > { %v617_v56 = vpop.f32.mrf.mxu3  ;;  %2668 = vmatpush.msk.msrb.mxu1 %vm3237_vm9, %v2944_v23  ;;  %v524_v5 = vperm.slane %v518_v60, 0  ;;  %v526_v6 = vperm.slane %v522_v62, 0  ;;  %v1435_v38 = vadd.f32 %v1434_v34, %v3323_v10 }
 0x14b   : > { %527 = vrot.lane.b32.xlu0 %v523_v54, %s2945_s10  ;;  %v641_v57 = vadd.f32 %v640_v55, %v617_v56 }
 0x14c   : > { %v734_v63 = vpop.f32.mrf.mxu2 }
 0x14d   : > { %v644_v0 = vrot.slane %v641_v57, 1  ;;  %v645_v1 = vrot.slane %v641_v57, 2  ;;  %v646_v2 = vrot.slane %v641_v57, 3  ;;  %654 = vst [vmem:[#allocation1] sm:$0xff] %v641_v57  ;;  %v735_v3 = vadd.f32 %v734_v63, %v3323_v10 }
 0x14e   : > { %650 = vst.msk [vmem:[%s3465_s9 + $0x2] sm:$0x1] %vm368_vm13, %v641_v57 }
 0x14f   : > { %2650 = vmatmul.msk.f32.vlgmr.msra.gmra.mxu3 %vm314_vm12, %v735_v3  ;;  %2661 = vmatmul.msk.f32.vlgmr.msra.gmra.mxu1 %vm314_vm12, %v872_v58  ;;  %651 = vst.msk [vmem:[%s3465_s9 + $0x12] sm:$0x1] %vm368_vm13, %v644_v0 }
 0x150   : > { %2664 = vmatpush.msk.msra.mxu3 %vm3255_vm10, %v2944_v23  ;;  %2675 = vmatpush.msk.msra.mxu1 %vm3233_vm8, %v2944_v23  ;;  %652 = vst.msk [vmem:[%s3465_s9 + $0x22] sm:$0x1] %vm368_vm13, %v645_v1 }
 0x151   : > { %531 = vrot.lane.b32.xlu2 %v525_v4, %s2945_s10  ;;  %529 = vrot.lane.b32.xlu1 %v524_v5, %s2945_s10  ;;  %653 = vst.msk [vmem:[%s3465_s9 + $0x32] sm:$0x1] %vm368_vm13, %v646_v2  ;;  %v1711_v17 = vpop.f32.mrf.mxu0 }
 0x152   : > { %2665 = vmatpush.msk.msra.mxu3 %vm3266_vm11, %v2944_v23  ;;  %2676 = vmatpush.msk.msra.mxu1 %vm3237_vm9, %v2944_v23  ;;  %v1712_v42 = vadd.f32 %v1711_v17, %v3311_v59 }
 0x153   : > { %533 = vrot.lane.b32.xlu0 %v526_v6, %s2945_s10 }
 0x154   : > { %v1011_v8 = vpop.f32.mrf.mxu2  ;;  %v658_v9 = vld [vmem:[#allocation1 + $0x5] ss:$9 sm:$0xff]  ;;  %v662_v24 = vld [vmem:[#allocation1 + $0x7] ss:$9 sm:$0xff] }
 0x155   : > { %v656_v11 = vld [vmem:[#allocation1 + $0x4] ss:$9 sm:$0xff]  ;;  %v1012_v13 = vadd.f32 %v1011_v8, %v3311_v59  ;;  %v660_v14 = vld [vmem:[#allocation1 + $0x6] ss:$9 sm:$0xff]  ;;  %v664_v15 = vperm.slane %v658_v9, 0  ;;  %v666_v29 = vperm.slane %v662_v24, 0 }
 0x156   : > { %v663_v16 = vperm.slane %v656_v11, 0  ;;  %v665_v18 = vperm.slane %v660_v14, 0 }
 0x157   : > { %2658 = vmatmul.msk.f32.vlgmr.msrb.gmra.mxu3 %vm314_vm12, %v875_v12  ;;  %2669 = vmatmul.msk.f32.vlgmr.msrb.gmra.mxu1 %vm314_vm12, %v1012_v13 }
 0x158   : > { %2672 = vmatpush.msk.msrb.mxu3 %vm3255_vm10, %v2944_v23  ;;  %2683 = vmatpush.msk.msrb.mxu1 %vm3233_vm8, %v2944_v23 }
 0x159   : > { %669 = vrot.lane.b32.xlu2 %v664_v15, %s2945_s10  ;;  %667 = vrot.lane.b32.xlu1 %v663_v16, %s2945_s10  ;;  %v1714_v40 = vpop.f32.mrf.mxu0 }
 0x15a   : > { %2673 = vmatpush.msk.msrb.mxu3 %vm3266_vm11, %v2944_v23  ;;  %2684 = vmatpush.msk.msrb.mxu1 %vm3237_vm9, %v2944_v23  ;;  %v1715_v46 = vadd.f32 %v1714_v40, %v3323_v10 }
 0x15b   : > { %671 = vrot.lane.b32.xlu0 %v665_v18, %s2945_s10 }
 0x15c   : > { %v1014_v20 = vpop.f32.mrf.mxu2 }
 0x15d   : > { %v1015_v27 = vadd.f32 %v1014_v20, %v3323_v10 }
 0x15f   : > { %2666 = vmatmul.msk.f32.vlgmr.msra.gmra.mxu3 %vm314_vm12, %v1015_v27  ;;  %2677 = vmatmul.msk.f32.vlgmr.msra.gmra.mxu1 %vm314_vm12, %v1152_v26 }
 0x160   : > { %2680 = vmatpush.msk.msra.mxu3 %vm3255_vm10, %v2944_v23  ;;  %2691 = vmatpush.msk.msra.mxu1 %vm3233_vm8, %v2944_v23 }
 0x161   : > { %673 = vrot.lane.b32.xlu1 %v666_v29, %s2945_s10  ;;  %v1991_v44 = vpop.f32.mrf.mxu0 }
 0x162   : > { %2681 = vmatpush.msk.msra.mxu3 %vm3266_vm11, %v2944_v23  ;;  %2692 = vmatpush.msk.msra.mxu1 %vm3237_vm9, %v2944_v23  ;;  %v1992_v49 = vadd.f32 %v1991_v44, %v3311_v59 }
 0x164   : > { %v1291_v30 = vpop.f32.mrf.mxu2 }
 0x165   : > { %v1292_v32 = vadd.f32 %v1291_v30, %v3311_v59 }
 0x167   : > { %2674 = vmatmul.msk.f32.vlgmr.msrb.gmra.mxu3 %vm314_vm12, %v1155_v31  ;;  %2685 = vmatmul.msk.f32.vlgmr.msrb.gmra.mxu1 %vm314_vm12, %v1292_v32 }
 0x168   : > { %2688 = vmatpush.msk.msrb.mxu3 %vm3255_vm10, %v2944_v23  ;;  %2699 = vmatpush.msk.msrb.mxu1 %vm3233_vm8, %v2944_v23 }
 0x169   : > { %v1994_v51 = vpop.f32.mrf.mxu0 }
 0x16a   : > { %2689 = vmatpush.msk.msrb.mxu3 %vm3266_vm11, %v2944_v23  ;;  %2700 = vmatpush.msk.msrb.mxu1 %vm3237_vm9, %v2944_v23  ;;  %v1995_v53 = vadd.f32 %v1994_v51, %v3323_v10 }
 0x16c   : > { %v1294_v35 = vpop.f32.mrf.mxu2 }
 0x16d   : > { %v1295_v33 = vadd.f32 %v1294_v35, %v3323_v10 }
 0x16f   : > { %2682 = vmatmul.msk.f32.vlgmr.msra.gmra.mxu3 %vm314_vm12, %v1295_v33  ;;  %2693 = vmatmul.msk.f32.vlgmr.msra.gmra.mxu1 %vm314_vm12, %v1432_v36 }
 0x170   : > { %2696 = vmatpush.msk.msra.mxu3 %vm3255_vm10, %v2944_v23  ;;  %2707 = vmatpush.msk.msra.mxu1 %vm3233_vm8, %v2944_v23 }
 0x171   : > { %v2271_v55 = vpop.f32.mrf.mxu0 }
 0x172   : > { %2697 = vmatpush.msk.msra.mxu3 %vm3266_vm11, %v2944_v23  ;;  %2708 = vmatpush.msk.msra.mxu1 %vm3237_vm9, %v2944_v23  ;;  %v2272_v58 = vadd.f32 %v2271_v55, %v3311_v59 }
 0x174   : > { %v1571_v37 = vpop.f32.mrf.mxu2 }
 0x175   : > { %v1572_v39 = vadd.f32 %v1571_v37, %v3311_v59 }
 0x177   : > { %2690 = vmatmul.msk.f32.vlgmr.msrb.gmra.mxu3 %vm314_vm12, %v1435_v38  ;;  %2701 = vmatmul.msk.f32.vlgmr.msrb.gmra.mxu1 %vm314_vm12, %v1572_v39 }
 0x178   : > { %2704 = vmatpush.msk.msrb.mxu3 %vm3255_vm10, %v2944_v23  ;;  %2715 = vmatpush.msk.msrb.mxu1 %vm3233_vm8, %v2944_v23 }
 0x179   : > { %v2274_v60 = vpop.f32.mrf.mxu0 }
 0x17a   : > { %2705 = vmatpush.msk.msrb.mxu3 %vm3266_vm11, %v2944_v23  ;;  %2716 = vmatpush.msk.msrb.mxu1 %vm3237_vm9, %v2944_v23  ;;  %v2275_v62 = vadd.f32 %v2274_v60, %v3323_v10 }
 0x17c   : > { %v1574_v41 = vpop.f32.mrf.mxu2 }
 0x17d   : > { %v1575_v43 = vadd.f32 %v1574_v41, %v3323_v10 }
 0x17f   : > { %2698 = vmatmul.msk.f32.vlgmr.msra.gmra.mxu3 %vm314_vm12, %v1575_v43  ;;  %2709 = vmatmul.msk.f32.vlgmr.msra.gmra.mxu1 %vm314_vm12, %v1712_v42 }
 0x180   : > { %2712 = vmatpush.msk.msra.mxu3 %vm3255_vm10, %v2944_v23  ;;  %2723 = vmatpush.msk.msra.mxu1 %vm3233_vm8, %v2944_v23 }
 0x182   : > { %2713 = vmatpush.msk.msra.mxu3 %vm3266_vm11, %v2944_v23  ;;  %2724 = vmatpush.msk.msra.mxu1 %vm3237_vm9, %v2944_v23 }
 0x184   : > { %v1851_v45 = vpop.f32.mrf.mxu2 }
 0x185   : > { %v1852_v47 = vadd.f32 %v1851_v45, %v3311_v59 }
 0x187   : > { %2706 = vmatmul.msk.f32.vlgmr.msrb.gmra.mxu3 %vm314_vm12, %v1715_v46  ;;  %2717 = vmatmul.msk.f32.vlgmr.msrb.gmra.mxu1 %vm314_vm12, %v1852_v47 }
 0x188   : > { %2720 = vmatpush.msk.msrb.mxu3 %vm3255_vm10, %v2944_v23  ;;  %2731 = vmatpush.msk.msrb.mxu1 %vm3233_vm8, %v2944_v23 }
 0x18a   : > { %2721 = vmatpush.msk.msrb.mxu3 %vm3266_vm11, %v2944_v23  ;;  %2732 = vmatpush.msk.msrb.mxu1 %vm3237_vm9, %v2944_v23 }
 0x18c   : > { %v1854_v48 = vpop.f32.mrf.mxu2 }
 0x18d   : > { %v1855_v50 = vadd.f32 %v1854_v48, %v3323_v10 }
 0x18f   : > { %2714 = vmatmul.msk.f32.vlgmr.msra.gmra.mxu3 %vm314_vm12, %v1855_v50  ;;  %2725 = vmatmul.msk.f32.vlgmr.msra.gmra.mxu1 %vm314_vm12, %v1992_v49 }
 0x190   : > { %2728 = vmatpush.msk.msra.mxu3 %vm3255_vm10, %v2944_v23  ;;  %2739 = vmatpush.msk.msra.mxu1 %vm3233_vm8, %v2944_v23 }
 0x192   : > { %2729 = vmatpush.msk.msra.mxu3 %vm3266_vm11, %v2944_v23  ;;  %2740 = vmatpush.msk.msra.mxu1 %vm3237_vm9, %v2944_v23 }
 0x194   : > { %v2131_v52 = vpop.f32.mrf.mxu2 }
 0x195   : > { %v2132_v54 = vadd.f32 %v2131_v52, %v3311_v59 }
 0x197   : > { %2722 = vmatmul.msk.f32.vlgmr.msrb.gmra.mxu3 %vm314_vm12, %v1995_v53  ;;  %2733 = vmatmul.msk.f32.vlgmr.msrb.gmra.mxu1 %vm314_vm12, %v2132_v54 }
 0x198   : > { %2736 = vmatpush.msk.msrb.mxu3 %vm3255_vm10, %v2944_v23  ;;  %2747 = vmatpush.msk.msrb.mxu1 %vm3233_vm8, %v2944_v23 }
 0x19a   : > { %2737 = vmatpush.msk.msrb.mxu3 %vm3266_vm11, %v2944_v23  ;;  %2748 = vmatpush.msk.msrb.mxu1 %vm3237_vm9, %v2944_v23 }
 0x19b   : > { %v391_v56 = vpop.permute.xlu2 %390 }
 0x19c   : > { %v2134_v57 = vpop.f32.mrf.mxu2  ;;  %401 = vst.msk [vmem:[%s3465_s9 + $0x20] sm:$0x1] %vm398_vm14, %v391_v56 }
 0x19d   : > { %v2135_v21 = vadd.f32 %v2134_v57, %v3323_v10 }
 0x19f   : > { %2730 = vmatmul.msk.f32.vlgmr.msra.gmra.mxu3 %vm314_vm12, %v2135_v21  ;;  %2741 = vmatmul.msk.f32.vlgmr.msra.gmra.mxu1 %vm314_vm12, %v2272_v58 }
 0x1a0   : > { %2744 = vmatpush.msk.msra.mxu3 %vm3255_vm10, %v2944_v23 }
 0x1a2   : > { %2745 = vmatpush.msk.msra.mxu3 %vm3266_vm11, %v2944_v23 }
 0x1a3   : > { %v393_v22 = vpop.permute.xlu2 %392 }
 0x1a4   : > { %v2411_v61 = vpop.f32.mrf.mxu2  ;;  %402 = vst.msk [vmem:[%s3465_s9 + $0x30] sm:$0x1] %vm398_vm14, %v393_v22 }
 0x1a5   : > { %v2412_v63 = vadd.f32 %v2411_v61, %v3311_v59 }
 0x1a7   : > { %2738 = vmatmul.msk.f32.vlgmr.msrb.gmra.mxu3 %vm314_vm12, %v2275_v62  ;;  %2749 = vmatmul.msk.f32.vlgmr.msrb.gmra.mxu1 %vm314_vm12, %v2412_v63 }
 0x1ab   : > { %v532_v25 = vpop.permute.xlu2 %531 }
 0x1ac   : > { %v2414_v28 = vpop.f32.mrf.mxu2  ;;  %541 = vst.msk [vmem:[%s3465_s9 + $0x21] sm:$0x1] %vm398_vm14, %v532_v25 }
 0x1ad   : > { %v2415_v23 = vadd.f32 %v2414_v28, %v3323_v10 }
 0x1af   : > { %2746 = vmatmul.msk.f32.vlgmr.msra.gmra.mxu3 %vm314_vm12, %v2415_v23 }
 0x1b3   : > { %v670_v0 = vpop.permute.xlu2 %669  ;;  %v387_v1 = vpop.permute.xlu1 %386 }
 0x1b4   : > { %680 = vst.msk [vmem:[%s3465_s9 + $0x12] sm:$0x1] %vm398_vm14, %v670_v0 }
 0x1b5   : > { %399 = vst.msk [vmem:[%s3465_s9] sm:$0x1] %vm398_vm14, %v387_v1 }
 0x1bb   : > { %v389_v59 = vpop.permute.xlu1 %388 }
 0x1bc   : > { %400 = vst.msk [vmem:[%s3465_s9 + $0x10] sm:$0x1] %vm398_vm14, %v389_v59 }
 0x1bd   : > { %v528_v2 = vpop.permute.xlu0 %527 }
 0x1be   : > { %539 = vst.msk [vmem:[%s3465_s9 + $0x1] sm:$0x1] %vm398_vm14, %v528_v2 }
 0x1c3   : > { %v530_v3 = vpop.permute.xlu1 %529 }
 0x1c4   : > { %v780_v4 = vpop.f32.mrf.mxu1  ;;  %540 = vst.msk [vmem:[%s3465_s9 + $0x11] sm:$0x1] %vm398_vm14, %v530_v3 }
 0x1c5   : > { %v534_v10 = vpop.permute.xlu0 %533 }
 0x1c6   : > { %542 = vst.msk [vmem:[%s3465_s9 + $0x31] sm:$0x1] %vm398_vm14, %v534_v10 }
 0x1cb   : > { %v668_v5 = vpop.permute.xlu1 %667 }
 0x1cc   : > { %v920_v6 = vpop.f32.mrf.mxu1  ;;  %679 = vst.msk [vmem:[%s3465_s9 + $0x2] sm:$0x1] %vm398_vm14, %v668_v5 }
 0x1cd   : > { %v672_v7 = vpop.permute.xlu0 %671 }
 0x1ce   : > { %681 = vst.msk [vmem:[%s3465_s9 + $0x22] sm:$0x1] %vm398_vm14, %v672_v7 }
 0x1d2   : > { %v757_v8 = vpop.f32.mrf.mxu3 }
 0x1d3   : > { %v781_v9 = vadd.f32 %v780_v4, %v757_v8  ;;  %v674_v11 = vpop.permute.xlu1 %673 }
 0x1d4   : > { %v1060_v12 = vpop.f32.mrf.mxu1  ;;  %682 = vst.msk [vmem:[%s3465_s9 + $0x32] sm:$0x1] %vm398_vm14, %v674_v11 }
 0x1d5   : > { %v784_v13 = vrot.slane %v781_v9, 1  ;;  %v785_v14 = vrot.slane %v781_v9, 2  ;;  %v786_v15 = vrot.slane %v781_v9, 3  ;;  %790 = vst.msk [vmem:[%s3465_s9 + $0x3] sm:$0x1] %vm368_vm13, %v781_v9 }
 0x1d6   : > { %794 = vst [vmem:[#allocation1] sm:$0xff] %v781_v9 }
 0x1d7   : > { %791 = vst.msk [vmem:[%s3465_s9 + $0x13] sm:$0x1] %vm368_vm13, %v784_v13 }
 0x1d8   : > { %792 = vst.msk [vmem:[%s3465_s9 + $0x23] sm:$0x1] %vm368_vm13, %v785_v14 }
 0x1d9   : > { %793 = vst.msk [vmem:[%s3465_s9 + $0x33] sm:$0x1] %vm368_vm13, %v786_v15 }
 0x1da   : > { %v897_v16 = vpop.f32.mrf.mxu3 }
 0x1db   : > { %v921_v18 = vadd.f32 %v920_v6, %v897_v16 }
 0x1dc   : > { %v1200_v19 = vpop.f32.mrf.mxu1 }
 0x1dd   : > { %v924_v20 = vrot.slane %v921_v18, 1  ;;  %v925_v24 = vrot.slane %v921_v18, 2  ;;  %v926_v26 = vrot.slane %v921_v18, 3  ;;  %930 = vst.msk [vmem:[%s3465_s9 + $0x4] sm:$0x1] %vm368_vm13, %v921_v18 }
 0x1de   : > { %v796_v27 = vld [vmem:[#allocation1 + $0x4] ss:$9 sm:$0xff]  ;;  %v800_v30 = vld [vmem:[#allocation1 + $0x6] ss:$9 sm:$0xff] }
 0x1df   : > { %v798_v29 = vld [vmem:[#allocation1 + $0x5] ss:$9 sm:$0xff]  ;;  %931 = vst.msk [vmem:[%s3465_s9 + $0x14] sm:$0x1] %vm368_vm13, %v924_v20  ;;  %v803_v31 = vperm.slane %v796_v27, 0  ;;  %v805_v34 = vperm.slane %v800_v30, 0 }
 0x1e0   : > { %v804_v32 = vperm.slane %v798_v29, 0  ;;  %932 = vst.msk [vmem:[%s3465_s9 + $0x24] sm:$0x1] %vm368_vm13, %v925_v24  ;;  %v802_v35 = vld [vmem:[#allocation1 + $0x7] ss:$9 sm:$0xff] }
 0x1e1   : > { %933 = vst.msk [vmem:[%s3465_s9 + $0x34] sm:$0x1] %vm368_vm13, %v926_v26  ;;  %807 = vrot.lane.b32.xlu2 %v803_v31, %s2945_s10  ;;  %811 = vrot.lane.b32.xlu1 %v805_v34, %s2945_s10  ;;  %v806_v40 = vperm.slane %v802_v35, 0 }
 0x1e2   : > { %809 = vrot.lane.b32.xlu0 %v804_v32, %s2945_s10  ;;  %v1037_v36 = vpop.f32.mrf.mxu3  ;;  %934 = vst [vmem:[#allocation1] sm:$0xff] %v921_v18 }
 0x1e3   : > { %v1061_v33 = vadd.f32 %v1060_v12, %v1037_v36 }
 0x1e4   : > { %v1340_v17 = vpop.f32.mrf.mxu1 }
 0x1e5   : > { %v1064_v37 = vrot.slane %v1061_v33, 1  ;;  %v1065_v38 = vrot.slane %v1061_v33, 2  ;;  %v1066_v39 = vrot.slane %v1061_v33, 3  ;;  %1070 = vst.msk [vmem:[%s3465_s9 + $0x5] sm:$0x1] %vm368_vm13, %v1061_v33 }
 0x1e7   : > { %1071 = vst.msk [vmem:[%s3465_s9 + $0x15] sm:$0x1] %vm368_vm13, %v1064_v37 }
 0x1e8   : > { %1072 = vst.msk [vmem:[%s3465_s9 + $0x25] sm:$0x1] %vm368_vm13, %v1065_v38 }
 0x1e9   : > { %1073 = vst.msk [vmem:[%s3465_s9 + $0x35] sm:$0x1] %vm368_vm13, %v1066_v39  ;;  %813 = vrot.lane.b32.xlu2 %v806_v40, %s2945_s10  ;;  %v936_v41 = vld [vmem:[#allocation1 + $0x4] ss:$9 sm:$0xff]  ;;  %v940_v46 = vld [vmem:[#allocation1 + $0x6] ss:$9 sm:$0xff] }
 0x1ea   : > { %v938_v42 = vld [vmem:[#allocation1 + $0x5] ss:$9 sm:$0xff]  ;;  %v943_v43 = vperm.slane %v936_v41, 0  ;;  %v1177_v45 = vpop.f32.mrf.mxu3  ;;  %v942_v47 = vld [vmem:[#allocation1 + $0x7] ss:$9 sm:$0xff]  ;;  %v945_v53 = vperm.slane %v940_v46, 0 }
 0x1eb   : > { %v944_v44 = vperm.slane %v938_v42, 0  ;;  %v1201_v48 = vadd.f32 %v1200_v19, %v1177_v45  ;;  %1074 = vst [vmem:[#allocation1] sm:$0xff] %v1061_v33  ;;  %v946_v54 = vperm.slane %v942_v47, 0 }
 0x1ec   : > { %947 = vrot.lane.b32.xlu0 %v943_v43, %s2945_s10  ;;  %v1480_v49 = vpop.f32.mrf.mxu1 }
 0x1ed   : > { %949 = vrot.lane.b32.xlu1 %v944_v44, %s2945_s10  ;;  %v1204_v50 = vrot.slane %v1201_v48, 1  ;;  %v1205_v51 = vrot.slane %v1201_v48, 2  ;;  %v1206_v52 = vrot.slane %v1201_v48, 3  ;;  %1210 = vst.msk [vmem:[%s3465_s9 + $0x6] sm:$0x1] %vm368_vm13, %v1201_v48 }
 0x1ef   : > { %1211 = vst.msk [vmem:[%s3465_s9 + $0x16] sm:$0x1] %vm368_vm13, %v1204_v50 }
 0x1f0   : > { %1212 = vst.msk [vmem:[%s3465_s9 + $0x26] sm:$0x1] %vm368_vm13, %v1205_v51 }
 0x1f1   : > { %1213 = vst.msk [vmem:[%s3465_s9 + $0x36] sm:$0x1] %vm368_vm13, %v1206_v52  ;;  %951 = vrot.lane.b32.xlu2 %v945_v53, %s2945_s10 }
 0x1f2   : > { %v1076_v55 = vld [vmem:[#allocation1 + $0x4] ss:$9 sm:$0xff]  ;;  %v1317_v56 = vpop.f32.mrf.mxu3  ;;  %v1080_v58 = vld [vmem:[#allocation1 + $0x6] ss:$9 sm:$0xff] }
 0x1f3   : > { %v1078_v57 = vld [vmem:[#allocation1 + $0x5] ss:$9 sm:$0xff]  ;;  %v1083_v21 = vperm.slane %v1076_v55, 0  ;;  %v1341_v60 = vadd.f32 %v1340_v17, %v1317_v56  ;;  %v1082_v22 = vld [vmem:[#allocation1 + $0x7] ss:$9 sm:$0xff]  ;;  %v1085_v23 = vperm.slane %v1080_v58, 0 }
 0x1f4   : > { %953 = vrot.lane.b32.xlu0 %v946_v54, %s2945_s10  ;;  %1214 = vst [vmem:[#allocation1] sm:$0xff] %v1201_v48  ;;  %v1620_v25 = vpop.f32.mrf.mxu1  ;;  %v1084_v28 = vperm.slane %v1078_v57, 0  ;;  %v1086_v0 = vperm.slane %v1082_v22, 0 }
 0x1f5   : > { %1087 = vrot.lane.b32.xlu1 %v1083_v21, %s2945_s10  ;;  %v1344_v61 = vrot.slane %v1341_v60, 1  ;;  %v1345_v62 = vrot.slane %v1341_v60, 2  ;;  %v1346_v63 = vrot.slane %v1341_v60, 3  ;;  %1350 = vst.msk [vmem:[%s3465_s9 + $0x7] sm:$0x1] %vm368_vm13, %v1341_v60 }
 0x1f7   : > { %1351 = vst.msk [vmem:[%s3465_s9 + $0x17] sm:$0x1] %vm368_vm13, %v1344_v61 }
 0x1f8   : > { %1352 = vst.msk [vmem:[%s3465_s9 + $0x27] sm:$0x1] %vm368_vm13, %v1345_v62 }
 0x1f9   : > { %1353 = vst.msk [vmem:[%s3465_s9 + $0x37] sm:$0x1] %vm368_vm13, %v1346_v63  ;;  %1089 = vrot.lane.b32.xlu2 %v1084_v28, %s2945_s10 }
 0x1fa   : > { %v1457_v1 = vpop.f32.mrf.mxu3 }
 0x1fb   : > { %v1481_v59 = vadd.f32 %v1480_v49, %v1457_v1  ;;  %v1216_v2 = vld [vmem:[#allocation1 + $0x4] ss:$9 sm:$0xff]  ;;  %v1220_v4 = vld [vmem:[#allocation1 + $0x6] ss:$9 sm:$0xff] }
 0x1fc   : > { %v1218_v3 = vld [vmem:[#allocation1 + $0x5] ss:$9 sm:$0xff]  ;;  %1091 = vrot.lane.b32.xlu0 %v1085_v23, %s2945_s10  ;;  %v1222_v10 = vld [vmem:[#allocation1 + $0x7] ss:$9 sm:$0xff]  ;;  %v1223_v8 = vperm.slane %v1216_v2, 0  ;;  %v1760_v9 = vpop.f32.mrf.mxu1  ;;  %v1225_v13 = vperm.slane %v1220_v4, 0 }
 0x1fd   : > { %1093 = vrot.lane.b32.xlu1 %v1086_v0, %s2945_s10  ;;  %v1484_v5 = vrot.slane %v1481_v59, 1  ;;  %v1485_v6 = vrot.slane %v1481_v59, 2  ;;  %v1486_v7 = vrot.slane %v1481_v59, 3  ;;  %1490 = vst.msk [vmem:[%s3465_s9 + $0x8] sm:$0x1] %vm368_vm13, %v1481_v59  ;;  %v1224_v11 = vperm.slane %v1218_v3, 0 }
 0x1fe   : > { %1354 = vst [vmem:[#allocation1] sm:$0xff] %v1341_v60  ;;  %v1226_v19 = vperm.slane %v1222_v10, 0 }
 0x1ff   : > { %1491 = vst.msk [vmem:[%s3465_s9 + $0x18] sm:$0x1] %vm368_vm13, %v1484_v5 }
 0x200   : > { %1492 = vst.msk [vmem:[%s3465_s9 + $0x28] sm:$0x1] %vm368_vm13, %v1485_v6 }
 0x201   : > { %1493 = vst.msk [vmem:[%s3465_s9 + $0x38] sm:$0x1] %vm368_vm13, %v1486_v7  ;;  %1227 = vrot.lane.b32.xlu2 %v1223_v8, %s2945_s10 }
 0x202   : > { %v1597_v12 = vpop.f32.mrf.mxu3 }
 0x203   : > { %v1621_v14 = vadd.f32 %v1620_v25, %v1597_v12 }
 0x204   : > { %1229 = vrot.lane.b32.xlu0 %v1224_v11, %s2945_s10  ;;  %v1900_v29 = vpop.f32.mrf.mxu1 }
 0x205   : > { %1231 = vrot.lane.b32.xlu1 %v1225_v13, %s2945_s10  ;;  %v1624_v15 = vrot.slane %v1621_v14, 1  ;;  %v1625_v16 = vrot.slane %v1621_v14, 2  ;;  %v1626_v18 = vrot.slane %v1621_v14, 3  ;;  %1630 = vst.msk [vmem:[%s3465_s9 + $0x9] sm:$0x1] %vm368_vm13, %v1621_v14 }
 0x206   : > { %v1356_v20 = vld [vmem:[#allocation1 + $0x4] ss:$9 sm:$0xff]  ;;  %v1360_v26 = vld [vmem:[#allocation1 + $0x6] ss:$9 sm:$0xff] }
 0x207   : > { %1631 = vst.msk [vmem:[%s3465_s9 + $0x19] sm:$0x1] %vm368_vm13, %v1624_v15  ;;  %v1358_v24 = vld [vmem:[#allocation1 + $0x5] ss:$9 sm:$0xff]  ;;  %v1362_v27 = vld [vmem:[#allocation1 + $0x7] ss:$9 sm:$0xff] }
 0x208   : > { %1632 = vst.msk [vmem:[%s3465_s9 + $0x29] sm:$0x1] %vm368_vm13, %v1625_v16  ;;  %v1363_v30 = vperm.slane %v1356_v20, 0  ;;  %v1364_v32 = vperm.slane %v1358_v24, 0  ;;  %v1365_v17 = vperm.slane %v1360_v26, 0  ;;  %v1366_v39 = vperm.slane %v1362_v27, 0 }
 0x209   : > { %1633 = vst.msk [vmem:[%s3465_s9 + $0x39] sm:$0x1] %vm368_vm13, %v1626_v18  ;;  %1233 = vrot.lane.b32.xlu2 %v1226_v19, %s2945_s10 }
 0x20a   : > { %v1737_v31 = vpop.f32.mrf.mxu3  ;;  %1494 = vst [vmem:[#allocation1] sm:$0xff] %v1481_v59 }
 0x20b   : > { %v1761_v34 = vadd.f32 %v1760_v9, %v1737_v31 }
 0x20c   : > { %1367 = vrot.lane.b32.xlu0 %v1363_v30, %s2945_s10  ;;  %v2040_v45 = vpop.f32.mrf.mxu1 }
 0x20d   : > { %1369 = vrot.lane.b32.xlu1 %v1364_v32, %s2945_s10  ;;  %v1764_v35 = vrot.slane %v1761_v34, 1  ;;  %v1765_v36 = vrot.slane %v1761_v34, 2  ;;  %v1766_v33 = vrot.slane %v1761_v34, 3  ;;  %1770 = vst.msk [vmem:[%s3465_s9 + $0xa] sm:$0x1] %vm368_vm13, %v1761_v34 }
 0x20f   : > { %1771 = vst.msk [vmem:[%s3465_s9 + $0x1a] sm:$0x1] %vm368_vm13, %v1764_v35 }
 0x210   : > { %1772 = vst.msk [vmem:[%s3465_s9 + $0x2a] sm:$0x1] %vm368_vm13, %v1765_v36 }
 0x211   : > { %1773 = vst.msk [vmem:[%s3465_s9 + $0x3a] sm:$0x1] %vm368_vm13, %v1766_v33  ;;  %1371 = vrot.lane.b32.xlu2 %v1365_v17, %s2945_s10  ;;  %v1496_v37 = vld [vmem:[#allocation1 + $0x4] ss:$9 sm:$0xff]  ;;  %v1500_v41 = vld [vmem:[#allocation1 + $0x6] ss:$9 sm:$0xff] }
 0x212   : > { %v1498_v38 = vld [vmem:[#allocation1 + $0x5] ss:$9 sm:$0xff]  ;;  %v1877_v40 = vpop.f32.mrf.mxu3  ;;  %v1502_v42 = vld [vmem:[#allocation1 + $0x7] ss:$9 sm:$0xff]  ;;  %v1503_v43 = vperm.slane %v1496_v37, 0  ;;  %v1505_v50 = vperm.slane %v1500_v41, 0 }
 0x213   : > { %v1901_v44 = vadd.f32 %v1900_v29, %v1877_v40  ;;  %1634 = vst [vmem:[#allocation1] sm:$0xff] %v1621_v14  ;;  %v1504_v49 = vperm.slane %v1498_v38, 0  ;;  %v1506_v55 = vperm.slane %v1502_v42, 0 }
 0x214   : > { %1373 = vrot.lane.b32.xlu0 %v1366_v39, %s2945_s10  ;;  %v2180_v22 = vpop.f32.mrf.mxu1 }
 0x215   : > { %1507 = vrot.lane.b32.xlu1 %v1503_v43, %s2945_s10  ;;  %v1904_v46 = vrot.slane %v1901_v44, 1  ;;  %v1905_v47 = vrot.slane %v1901_v44, 2  ;;  %v1906_v48 = vrot.slane %v1901_v44, 3  ;;  %1910 = vst.msk [vmem:[%s3465_s9 + $0xb] sm:$0x1] %vm368_vm13, %v1901_v44 }
 0x217   : > { %1911 = vst.msk [vmem:[%s3465_s9 + $0x1b] sm:$0x1] %vm368_vm13, %v1904_v46 }
 0x218   : > { %1912 = vst.msk [vmem:[%s3465_s9 + $0x2b] sm:$0x1] %vm368_vm13, %v1905_v47 }
 0x219   : > { %1913 = vst.msk [vmem:[%s3465_s9 + $0x3b] sm:$0x1] %vm368_vm13, %v1906_v48  ;;  %1509 = vrot.lane.b32.xlu2 %v1504_v49, %s2945_s10 }
 0x21a   : > { %v2017_v51 = vpop.f32.mrf.mxu3  ;;  %v1636_v52 = vld [vmem:[#allocation1 + $0x4] ss:$9 sm:$0xff]  ;;  %v1640_v54 = vld [vmem:[#allocation1 + $0x6] ss:$9 sm:$0xff] }
 0x21b   : > { %v1638_v53 = vld [vmem:[#allocation1 + $0x5] ss:$9 sm:$0xff]  ;;  %v2041_v56 = vadd.f32 %v2040_v45, %v2017_v51  ;;  %v1642_v57 = vld [vmem:[#allocation1 + $0x7] ss:$9 sm:$0xff]  ;;  %v1643_v61 = vperm.slane %v1636_v52, 0  ;;  %v1645_v63 = vperm.slane %v1640_v54, 0 }
 0x21c   : > { %1511 = vrot.lane.b32.xlu0 %v1505_v50, %s2945_s10  ;;  %1774 = vst [vmem:[#allocation1] sm:$0xff] %v1761_v34  ;;  %v1644_v62 = vperm.slane %v1638_v53, 0  ;;  %v1646_v10 = vperm.slane %v1642_v57, 0  ;;  %v2320_v5 = vpop.f32.mrf.mxu1 }
 0x21d   : > { %1513 = vrot.lane.b32.xlu1 %v1506_v55, %s2945_s10  ;;  %v2044_v58 = vrot.slane %v2041_v56, 1  ;;  %v2045_v21 = vrot.slane %v2041_v56, 2  ;;  %v2046_v60 = vrot.slane %v2041_v56, 3  ;;  %2050 = vst.msk [vmem:[%s3465_s9 + $0xc] sm:$0x1] %vm368_vm13, %v2041_v56 }
 0x21f   : > { %2051 = vst.msk [vmem:[%s3465_s9 + $0x1c] sm:$0x1] %vm368_vm13, %v2044_v58 }
 0x220   : > { %2052 = vst.msk [vmem:[%s3465_s9 + $0x2c] sm:$0x1] %vm368_vm13, %v2045_v21 }
 0x221   : > { %2053 = vst.msk [vmem:[%s3465_s9 + $0x3c] sm:$0x1] %vm368_vm13, %v2046_v60  ;;  %1647 = vrot.lane.b32.xlu2 %v1643_v61, %s2945_s10 }
 0x222   : > { %v2157_v25 = vpop.f32.mrf.mxu3 }
 0x223   : > { %v2181_v28 = vadd.f32 %v2180_v22, %v2157_v25  ;;  %v1776_v23 = vld [vmem:[#allocation1 + $0x4] ss:$9 sm:$0xff]  ;;  %v1780_v1 = vld [vmem:[#allocation1 + $0x6] ss:$9 sm:$0xff] }
 0x224   : > { %v1778_v0 = vld [vmem:[#allocation1 + $0x5] ss:$9 sm:$0xff]  ;;  %1649 = vrot.lane.b32.xlu0 %v1644_v62, %s2945_s10  ;;  %v1782_v59 = vld [vmem:[#allocation1 + $0x7] ss:$9 sm:$0xff]  ;;  %v1783_v6 = vperm.slane %v1776_v23, 0  ;;  %v1785_v14 = vperm.slane %v1780_v1, 0  ;;  %v2460_v20 = vpop.f32.mrf.mxu1 }
 0x225   : > { %1651 = vrot.lane.b32.xlu1 %v1645_v63, %s2945_s10  ;;  %v2184_v2 = vrot.slane %v2181_v28, 1  ;;  %v2185_v3 = vrot.slane %v2181_v28, 2  ;;  %v2186_v4 = vrot.slane %v2181_v28, 3  ;;  %2190 = vst.msk [vmem:[%s3465_s9 + $0xd] sm:$0x1] %vm368_vm13, %v2181_v28  ;;  %v1784_v8 = vperm.slane %v1778_v0, 0 }
 0x226   : > { %1914 = vst [vmem:[#allocation1] sm:$0xff] %v1901_v44  ;;  %v1786_v24 = vperm.slane %v1782_v59, 0 }
 0x227   : > { %2191 = vst.msk [vmem:[%s3465_s9 + $0x1d] sm:$0x1] %vm368_vm13, %v2184_v2 }
 0x228   : > { %2192 = vst.msk [vmem:[%s3465_s9 + $0x2d] sm:$0x1] %vm368_vm13, %v2185_v3 }
 0x229   : > { %2193 = vst.msk [vmem:[%s3465_s9 + $0x3d] sm:$0x1] %vm368_vm13, %v2186_v4  ;;  %1653 = vrot.lane.b32.xlu2 %v1646_v10, %s2945_s10 }
 0x22a   : > { %v2297_v7 = vpop.f32.mrf.mxu3 }
 0x22b   : > { %v2321_v9 = vadd.f32 %v2320_v5, %v2297_v7 }
 0x22c   : > { %1787 = vrot.lane.b32.xlu0 %v1783_v6, %s2945_s10 }
 0x22d   : > { %1789 = vrot.lane.b32.xlu1 %v1784_v8, %s2945_s10  ;;  %v2324_v11 = vrot.slane %v2321_v9, 1  ;;  %v2325_v12 = vrot.slane %v2321_v9, 2  ;;  %v2326_v13 = vrot.slane %v2321_v9, 3  ;;  %2330 = vst.msk [vmem:[%s3465_s9 + $0xe] sm:$0x1] %vm368_vm13, %v2321_v9 }
 0x22e   : > { %v1916_v15 = vld [vmem:[#allocation1 + $0x4] ss:$9 sm:$0xff]  ;;  %v1920_v18 = vld [vmem:[#allocation1 + $0x6] ss:$9 sm:$0xff] }
 0x22f   : > { %2331 = vst.msk [vmem:[%s3465_s9 + $0x1e] sm:$0x1] %vm368_vm13, %v2324_v11  ;;  %v1918_v16 = vld [vmem:[#allocation1 + $0x5] ss:$9 sm:$0xff]  ;;  %v1922_v19 = vld [vmem:[#allocation1 + $0x7] ss:$9 sm:$0xff] }
 0x230   : > { %2332 = vst.msk [vmem:[%s3465_s9 + $0x2e] sm:$0x1] %vm368_vm13, %v2325_v12  ;;  %v1923_v27 = vperm.slane %v1916_v15, 0  ;;  %v1924_v34 = vperm.slane %v1918_v16, 0  ;;  %v1925_v33 = vperm.slane %v1920_v18, 0  ;;  %v1926_v38 = vperm.slane %v1922_v19, 0 }
 0x231   : > { %2333 = vst.msk [vmem:[%s3465_s9 + $0x3e] sm:$0x1] %vm368_vm13, %v2326_v13  ;;  %1791 = vrot.lane.b32.xlu2 %v1785_v14, %s2945_s10 }
 0x232   : > { %v2437_v26 = vpop.f32.mrf.mxu3  ;;  %2054 = vst [vmem:[#allocation1] sm:$0xff] %v2041_v56 }
 0x233   : > { %v2461_v29 = vadd.f32 %v2460_v20, %v2437_v26 }
 0x234   : > { %1793 = vrot.lane.b32.xlu0 %v1786_v24, %s2945_s10 }
 0x235   : > { %1927 = vrot.lane.b32.xlu1 %v1923_v27, %s2945_s10  ;;  %v2464_v30 = vrot.slane %v2461_v29, 1  ;;  %v2465_v31 = vrot.slane %v2461_v29, 2  ;;  %v2466_v32 = vrot.slane %v2461_v29, 3  ;;  %2470 = vst.msk [vmem:[%s3465_s9 + $0xf] sm:$0x1] %vm368_vm13, %v2461_v29 }
 0x237   : > { %2471 = vst.msk [vmem:[%s3465_s9 + $0x1f] sm:$0x1] %vm368_vm13, %v2464_v30 }
 0x238   : > { %2472 = vst.msk [vmem:[%s3465_s9 + $0x2f] sm:$0x1] %vm368_vm13, %v2465_v31 }
 0x239   : > { %2473 = vst.msk [vmem:[%s3465_s9 + $0x3f] sm:$0x1] %vm368_vm13, %v2466_v32  ;;  %1929 = vrot.lane.b32.xlu2 %v1924_v34, %s2945_s10  ;;  %v2056_v35 = vld [vmem:[#allocation1 + $0x4] ss:$9 sm:$0xff]  ;;  %v2060_v17 = vld [vmem:[#allocation1 + $0x6] ss:$9 sm:$0xff] }
 0x23a   : > { %v2058_v36 = vld [vmem:[#allocation1 + $0x5] ss:$9 sm:$0xff]  ;;  %v2062_v37 = vld [vmem:[#allocation1 + $0x7] ss:$9 sm:$0xff]  ;;  %v2063_v40 = vperm.slane %v2056_v35, 0  ;;  %v2065_v45 = vperm.slane %v2060_v17, 0 }
 0x23b   : > { %v808_v39 = vpop.permute.xlu2 %807  ;;  %2194 = vst [vmem:[#allocation1] sm:$0xff] %v2181_v28  ;;  %v2064_v41 = vperm.slane %v2058_v36, 0  ;;  %v2066_v48 = vperm.slane %v2062_v37, 0 }
 0x23c   : > { %1931 = vrot.lane.b32.xlu0 %v1925_v33, %s2945_s10  ;;  %819 = vst.msk [vmem:[%s3465_s9 + $0x3] sm:$0x1] %vm398_vm14, %v808_v39 }
 0x23d   : > { %1933 = vrot.lane.b32.xlu1 %v1926_v38, %s2945_s10 }
 0x241   : > { %2067 = vrot.lane.b32.xlu2 %v2063_v40, %s2945_s10 }
 0x242   : > { %v2196_v42 = vld [vmem:[#allocation1 + $0x4] ss:$9 sm:$0xff]  ;;  %v2200_v44 = vld [vmem:[#allocation1 + $0x6] ss:$9 sm:$0xff] }
 0x243   : > { %v2198_v43 = vld [vmem:[#allocation1 + $0x5] ss:$9 sm:$0xff]  ;;  %v814_v46 = vpop.permute.xlu2 %813  ;;  %v2202_v47 = vld [vmem:[#allocation1 + $0x7] ss:$9 sm:$0xff]  ;;  %v2203_v49 = vperm.slane %v2196_v42, 0  ;;  %v2205_v56 = vperm.slane %v2200_v44, 0 }
 0x244   : > { %2069 = vrot.lane.b32.xlu0 %v2064_v41, %s2945_s10  ;;  %822 = vst.msk [vmem:[%s3465_s9 + $0x33] sm:$0x1] %vm398_vm14, %v814_v46  ;;  %v2204_v50 = vperm.slane %v2198_v43, 0  ;;  %v2206_v57 = vperm.slane %v2202_v47, 0 }
 0x245   : > { %2071 = vrot.lane.b32.xlu1 %v2065_v45, %s2945_s10  ;;  %2334 = vst [vmem:[#allocation1] sm:$0xff] %v2321_v9 }
 0x249   : > { %2073 = vrot.lane.b32.xlu2 %v2066_v48, %s2945_s10 }
 0x24b   : > { %v952_v51 = vpop.permute.xlu2 %951 }
 0x24c   : > { %2207 = vrot.lane.b32.xlu0 %v2203_v49, %s2945_s10  ;;  %961 = vst.msk [vmem:[%s3465_s9 + $0x24] sm:$0x1] %vm398_vm14, %v952_v51  ;;  %v2336_v52 = vld [vmem:[#allocation1 + $0x4] ss:$9 sm:$0xff]  ;;  %v2340_v54 = vld [vmem:[#allocation1 + $0x6] ss:$9 sm:$0xff] }
 0x24d   : > { %v2338_v53 = vld [vmem:[#allocation1 + $0x5] ss:$9 sm:$0xff]  ;;  %2209 = vrot.lane.b32.xlu1 %v2204_v50, %s2945_s10  ;;  %v2342_v55 = vld [vmem:[#allocation1 + $0x7] ss:$9 sm:$0xff]  ;;  %v2343_v58 = vperm.slane %v2336_v52, 0  ;;  %v2345_v62 = vperm.slane %v2340_v54, 0 }
 0x24e   : > { %2474 = vst [vmem:[#allocation1] sm:$0xff] %v2461_v29  ;;  %v2344_v61 = vperm.slane %v2338_v53, 0  ;;  %v2346_v63 = vperm.slane %v2342_v55, 0 }
 0x251   : > { %2211 = vrot.lane.b32.xlu2 %v2205_v56, %s2945_s10 }
 0x253   : > { %v1090_v21 = vpop.permute.xlu2 %1089  ;;  %v812_v22 = vpop.permute.xlu1 %811 }
 0x254   : > { %v810_v60 = vpop.permute.xlu0 %809  ;;  %2213 = vrot.lane.b32.xlu0 %v2206_v57, %s2945_s10  ;;  %1100 = vst.msk [vmem:[%s3465_s9 + $0x15] sm:$0x1] %vm398_vm14, %v1090_v21 }
 0x255   : > { %2347 = vrot.lane.b32.xlu1 %v2343_v58, %s2945_s10  ;;  %820 = vst.msk [vmem:[%s3465_s9 + $0x13] sm:$0x1] %vm398_vm14, %v810_v60  ;;  %v2476_v28 = vld [vmem:[#allocation1 + $0x4] ss:$9 sm:$0xff]  ;;  %v2480_v2 = vld [vmem:[#allocation1 + $0x6] ss:$9 sm:$0xff] }
 0x256   : > { %821 = vst.msk [vmem:[%s3465_s9 + $0x23] sm:$0x1] %vm398_vm14, %v812_v22  ;;  %v2483_v1 = vperm.slane %v2476_v28, 0  ;;  %v2478_v59 = vld [vmem:[#allocation1 + $0x5] ss:$9 sm:$0xff]  ;;  %v2485_v4 = vperm.slane %v2480_v2, 0 }
 0x257   : > { %v2484_v3 = vperm.slane %v2478_v59, 0  ;;  %v2482_v5 = vld [vmem:[#allocation1 + $0x7] ss:$9 sm:$0xff] }
 0x258   : > { %v2486_v8 = vperm.slane %v2482_v5, 0 }
 0x259   : > { %2349 = vrot.lane.b32.xlu2 %v2344_v61, %s2945_s10 }
 0x25b   : > { %v1228_v25 = vpop.permute.xlu2 %1227 }
 0x25c   : > { %2351 = vrot.lane.b32.xlu0 %v2345_v62, %s2945_s10  ;;  %1239 = vst.msk [vmem:[%s3465_s9 + $0x6] sm:$0x1] %vm398_vm14, %v1228_v25 }
 0x25d   : > { %2353 = vrot.lane.b32.xlu1 %v2346_v63, %s2945_s10 }
 0x25e   : > { %v948_v23 = vpop.permute.xlu0 %947 }
 0x25f   : > { %v950_v0 = vpop.permute.xlu1 %949  ;;  %959 = vst.msk [vmem:[%s3465_s9 + $0x4] sm:$0x1] %vm398_vm14, %v948_v23 }
 0x260   : > { %960 = vst.msk [vmem:[%s3465_s9 + $0x14] sm:$0x1] %vm398_vm14, %v950_v0 }
 0x261   : > { %2487 = vrot.lane.b32.xlu2 %v2483_v1, %s2945_s10 }
 0x263   : > { %v1234_v10 = vpop.permute.xlu2 %1233 }
 0x264   : > { %2489 = vrot.lane.b32.xlu0 %v2484_v3, %s2945_s10  ;;  %1242 = vst.msk [vmem:[%s3465_s9 + $0x36] sm:$0x1] %vm398_vm14, %v1234_v10 }
 0x265   : > { %2491 = vrot.lane.b32.xlu1 %v2485_v4, %s2945_s10 }
 0x266   : > { %v954_v6 = vpop.permute.xlu0 %953 }
 0x267   : > { %962 = vst.msk [vmem:[%s3465_s9 + $0x34] sm:$0x1] %vm398_vm14, %v954_v6  ;;  %v1088_v7 = vpop.permute.xlu1 %1087 }
 0x268   : > { %1099 = vst.msk [vmem:[%s3465_s9 + $0x5] sm:$0x1] %vm398_vm14, %v1088_v7 }
 0x269   : > { %2493 = vrot.lane.b32.xlu2 %v2486_v8, %s2945_s10 }
 0x26b   : > { %v1372_v9 = vpop.permute.xlu2 %1371 }
 0x26c   : > { %1381 = vst.msk [vmem:[%s3465_s9 + $0x27] sm:$0x1] %vm398_vm14, %v1372_v9 }
 0x26e   : > { %v1092_v11 = vpop.permute.xlu0 %1091 }
 0x26f   : > { %1101 = vst.msk [vmem:[%s3465_s9 + $0x25] sm:$0x1] %vm398_vm14, %v1092_v11  ;;  %v1094_v12 = vpop.permute.xlu1 %1093 }
 0x270   : > { %1102 = vst.msk [vmem:[%s3465_s9 + $0x35] sm:$0x1] %vm398_vm14, %v1094_v12 }
 0x273   : > { %v1510_v13 = vpop.permute.xlu2 %1509 }
 0x274   : > { %1520 = vst.msk [vmem:[%s3465_s9 + $0x18] sm:$0x1] %vm398_vm14, %v1510_v13 }
 0x276   : > { %v1230_v14 = vpop.permute.xlu0 %1229 }
 0x277   : > { %1240 = vst.msk [vmem:[%s3465_s9 + $0x16] sm:$0x1] %vm398_vm14, %v1230_v14  ;;  %v1232_v15 = vpop.permute.xlu1 %1231 }
 0x278   : > { %1241 = vst.msk [vmem:[%s3465_s9 + $0x26] sm:$0x1] %vm398_vm14, %v1232_v15 }
 0x27b   : > { %v1648_v16 = vpop.permute.xlu2 %1647 }
 0x27c   : > { %1659 = vst.msk [vmem:[%s3465_s9 + $0x9] sm:$0x1] %vm398_vm14, %v1648_v16 }
 0x27e   : > { %v1368_v18 = vpop.permute.xlu0 %1367 }
 0x27f   : > { %1379 = vst.msk [vmem:[%s3465_s9 + $0x7] sm:$0x1] %vm398_vm14, %v1368_v18  ;;  %v1370_v19 = vpop.permute.xlu1 %1369 }
 0x280   : > { %1380 = vst.msk [vmem:[%s3465_s9 + $0x17] sm:$0x1] %vm398_vm14, %v1370_v19 }
 0x283   : > { %v1654_v20 = vpop.permute.xlu2 %1653 }
 0x284   : > { %1662 = vst.msk [vmem:[%s3465_s9 + $0x39] sm:$0x1] %vm398_vm14, %v1654_v20 }
 0x286   : > { %v1374_v24 = vpop.permute.xlu0 %1373 }
 0x287   : > { %1382 = vst.msk [vmem:[%s3465_s9 + $0x37] sm:$0x1] %vm398_vm14, %v1374_v24  ;;  %v1508_v26 = vpop.permute.xlu1 %1507 }
 0x288   : > { %1519 = vst.msk [vmem:[%s3465_s9 + $0x8] sm:$0x1] %vm398_vm14, %v1508_v26 }
 0x28b   : > { %v1792_v27 = vpop.permute.xlu2 %1791 }
 0x28c   : > { %1801 = vst.msk [vmem:[%s3465_s9 + $0x2a] sm:$0x1] %vm398_vm14, %v1792_v27 }
 0x28e   : > { %v1512_v29 = vpop.permute.xlu0 %1511 }
 0x28f   : > { %1521 = vst.msk [vmem:[%s3465_s9 + $0x28] sm:$0x1] %vm398_vm14, %v1512_v29  ;;  %v1514_v30 = vpop.permute.xlu1 %1513 }
 0x290   : > { %1522 = vst.msk [vmem:[%s3465_s9 + $0x38] sm:$0x1] %vm398_vm14, %v1514_v30 }
 0x293   : > { %v1930_v31 = vpop.permute.xlu2 %1929 }
 0x294   : > { %1940 = vst.msk [vmem:[%s3465_s9 + $0x1b] sm:$0x1] %vm398_vm14, %v1930_v31 }
 0x296   : > { %v1650_v32 = vpop.permute.xlu0 %1649 }
 0x297   : > { %1660 = vst.msk [vmem:[%s3465_s9 + $0x19] sm:$0x1] %vm398_vm14, %v1650_v32  ;;  %v1652_v34 = vpop.permute.xlu1 %1651 }
 0x298   : > { %1661 = vst.msk [vmem:[%s3465_s9 + $0x29] sm:$0x1] %vm398_vm14, %v1652_v34 }
 0x29b   : > { %v2068_v35 = vpop.permute.xlu2 %2067 }
 0x29c   : > { %2079 = vst.msk [vmem:[%s3465_s9 + $0xc] sm:$0x1] %vm398_vm14, %v2068_v35 }
 0x29e   : > { %v1788_v36 = vpop.permute.xlu0 %1787 }
 0x29f   : > { %1799 = vst.msk [vmem:[%s3465_s9 + $0xa] sm:$0x1] %vm398_vm14, %v1788_v36  ;;  %v1790_v33 = vpop.permute.xlu1 %1789 }
 0x2a0   : > { %1800 = vst.msk [vmem:[%s3465_s9 + $0x1a] sm:$0x1] %vm398_vm14, %v1790_v33 }
 0x2a3   : > { %v2074_v17 = vpop.permute.xlu2 %2073 }
 0x2a4   : > { %2082 = vst.msk [vmem:[%s3465_s9 + $0x3c] sm:$0x1] %vm398_vm14, %v2074_v17 }
 0x2a6   : > { %v1794_v37 = vpop.permute.xlu0 %1793 }
 0x2a7   : > { %1802 = vst.msk [vmem:[%s3465_s9 + $0x3a] sm:$0x1] %vm398_vm14, %v1794_v37  ;;  %v1928_v38 = vpop.permute.xlu1 %1927 }
 0x2a8   : > { %1939 = vst.msk [vmem:[%s3465_s9 + $0xb] sm:$0x1] %vm398_vm14, %v1928_v38 }
 0x2ab   : > { %v2212_v39 = vpop.permute.xlu2 %2211 }
 0x2ac   : > { %2221 = vst.msk [vmem:[%s3465_s9 + $0x2d] sm:$0x1] %vm398_vm14, %v2212_v39 }
 0x2ae   : > { %v1932_v40 = vpop.permute.xlu0 %1931 }
 0x2af   : > { %1941 = vst.msk [vmem:[%s3465_s9 + $0x2b] sm:$0x1] %vm398_vm14, %v1932_v40  ;;  %v1934_v41 = vpop.permute.xlu1 %1933 }
 0x2b0   : > { %1942 = vst.msk [vmem:[%s3465_s9 + $0x3b] sm:$0x1] %vm398_vm14, %v1934_v41 }
 0x2b3   : > { %v2350_v42 = vpop.permute.xlu2 %2349 }
 0x2b4   : > { %2360 = vst.msk [vmem:[%s3465_s9 + $0x1e] sm:$0x1] %vm398_vm14, %v2350_v42 }
 0x2b6   : > { %v2070_v43 = vpop.permute.xlu0 %2069 }
 0x2b7   : > { %2080 = vst.msk [vmem:[%s3465_s9 + $0x1c] sm:$0x1] %vm398_vm14, %v2070_v43  ;;  %v2072_v44 = vpop.permute.xlu1 %2071 }
 0x2b8   : > { %2081 = vst.msk [vmem:[%s3465_s9 + $0x2c] sm:$0x1] %vm398_vm14, %v2072_v44 }
 0x2bb   : > { %v2488_v45 = vpop.permute.xlu2 %2487 }
 0x2bc   : > { %2499 = vst.msk [vmem:[%s3465_s9 + $0xf] sm:$0x1] %vm398_vm14, %v2488_v45 }
 0x2be   : > { %v2208_v46 = vpop.permute.xlu0 %2207 }
 0x2bf   : > { %2219 = vst.msk [vmem:[%s3465_s9 + $0xd] sm:$0x1] %vm398_vm14, %v2208_v46  ;;  %v2210_v47 = vpop.permute.xlu1 %2209 }
 0x2c0   : > { %2220 = vst.msk [vmem:[%s3465_s9 + $0x1d] sm:$0x1] %vm398_vm14, %v2210_v47 }
 0x2c3   : > { %v2494_v48 = vpop.permute.xlu2 %2493 }
 0x2c4   : > { %2502 = vst.msk [vmem:[%s3465_s9 + $0x3f] sm:$0x1] %vm398_vm14, %v2494_v48 }
 0x2c6   : > { %v2214_v49 = vpop.permute.xlu0 %2213 }
 0x2c7   : > { %2222 = vst.msk [vmem:[%s3465_s9 + $0x3d] sm:$0x1] %vm398_vm14, %v2214_v49  ;;  %v2348_v50 = vpop.permute.xlu1 %2347 }
 0x2c8   : > { %2359 = vst.msk [vmem:[%s3465_s9 + $0xe] sm:$0x1] %vm398_vm14, %v2348_v50 }
 0x2ce   : > { %v2352_v51 = vpop.permute.xlu0 %2351 }
 0x2cf   : > { %2361 = vst.msk [vmem:[%s3465_s9 + $0x2e] sm:$0x1] %vm398_vm14, %v2352_v51  ;;  %v2354_v52 = vpop.permute.xlu1 %2353 }
 0x2d0   : > { %2362 = vst.msk [vmem:[%s3465_s9 + $0x3e] sm:$0x1] %vm398_vm14, %v2354_v52 }
 0x2d6   : > { %v2490_v53 = vpop.permute.xlu0 %2489 }
 0x2d7   : > { %2500 = vst.msk [vmem:[%s3465_s9 + $0x1f] sm:$0x1] %vm398_vm14, %v2490_v53  ;;  %v2492_v54 = vpop.permute.xlu1 %2491 }
 0x2d8   : > { %2501 = vst.msk [vmem:[%s3465_s9 + $0x2f] sm:$0x1] %vm398_vm14, %v2492_v54 }
 0x2d9   : > { %2884 = shalt.err (!%p2881_p13)
}
 0x2da   : > { %s2946_s19 = smov 128   ;;  %s2947_s8 = smov 8  }
 0x2db   : > { %2759 = dma.vmem_to_hbm [thread:$0]  (%p3019_p9), %s2519_s29, 1024, %s2521_s22, %s2504_s15, %s2946_s19, %s2946_s19, %s2947_s8  }
 0x2dc PF: > { %s2535_s9 = sand.u32 1, %s2919_s12   ;;  %p2766_p0 = pnand %p2611_p12, %p3026_p11 }
 0x2dd   : > { %s2536_s10 = scalar_lea.sflag [#allocation4], %s2535_s9 }
 0x2de   : > { %p2767_p1 = pneg %p2766_p0 }
 0x2e0   : > { %2914 = dma.done.wait (%p2767_p1), %s2536_s10, 1024  }
 0x2e1   : > { %2916 = vsyncadd (%p2767_p1), %s2536_s10, 4294966272  ;;  %s19_s17 = sadd.s32 1, %s2939_s17   ;;  %s4029_s12 = smov %s2923_s13 }
 0x2e2   : > { %p16_p2 = scmp.ge.s32.totalorder %s19_s17, 4   ;;  %s4030_s13 = smov %s2927_s14 }
 0x2e3   : > { %s4031_s14 = smov %s3024_s26  ;;  %s4032_s15 = smov %s2935_s16 }
 0x2e4   : > { %s4033_s16 = smov %s4035_s20  ;;  %18 = sbr.rel (!%p16_p2) target bundleno = 6 (0x6), region = 141 }
 0x2e9   :  { %2542 = vsyncpa [#allocation3], 1 }
 0x2ea   :  { %2544 = vsyncpa [#allocation3 + $0x1], 1 }
 0x2eb   :  { %2545 = vsyncpa [#allocation4], 1 }
 0x2ec   :  { %2547 = vsyncpa [#allocation4 + $0x1], 1 }

</bundles_post_ra>
